<compile_context>
chip_gen: v5e
topology: v5e:2x2
jax: 0.10.0
libtpu: 0.0.40
codegen_flags: <defaults>
</compile_context>

<pallas_src>
import functools

import jax
import jax.numpy as jnp
from jax import lax
from jax.experimental import pallas as pl
from jax.experimental.pallas import tpu as pltpu


def cnn_bilstm_kernel(
    x_ref,      # (B, F*L)    VMEM  flattened input (row index b, col f*L + l)
    cmat_ref,   # (F*L, T)    VMEM  Conv1d(k=2) as a matrix (no bias)
    wbig_ref,   # (T, T*8H)   VMEM  all-step gate-input weights, both directions
    bias_ref,   # (1, T*8H)   VMEM  conv-bias * W_ih + b_ih + b_hh, tiled over T
    whh_ref,    # (2H, 8H)    VMEM  block-diagonal W_hh^T in fused gate layout
    w1_ref,     # (2H, H//2)  VMEM  fc1 weight^T
    b1_ref,     # (1, H//2)   VMEM
    w2_ref,     # (H//2, 1)   VMEM  fc2 weight^T
    b2_ref,     # (1, 1)      VMEM
    out_ref,    # (B, 1)      VMEM
    gx_ref,     # (B, T*8H)   VMEM scratch: precomputed gate inputs, lane-major
    *,
    seq_steps,
    n_hidden,
    neg_slope,
):
    T, H = seq_steps, n_hidden
    H2, G = 2 * H, 8 * H
    f32 = jnp.float32
    B = out_ref.shape[0]

    # ---- Prologue (off the serial chain): conv + im2col + direction fusion +
    #      gate-input projection, folded into two MXU dots (default precision). ----
    conv = jnp.dot(x_ref[...], cmat_ref[...], preferred_element_type=f32)   # (B, T)
    gx_ref[...] = (jnp.dot(conv, wbig_ref[...], preferred_element_type=f32)
                   + bias_ref[...])                                          # (B, T*8H)

    whh = whh_ref[...]                               # (2H, 8H), stays vreg-resident

    # Per-lane activation constants (hoisted; fused gate layout [f | i | o | g]):
    #   sigmoid(x) = 0.5*tanh(0.5*x) + 0.5  -> one EUP push covers all four gates.
    col = lax.broadcasted_iota(jnp.int32, (1, G), 1)
    is_sig = col < 3 * H2
    scale = jnp.where(is_sig, jnp.float32(0.5), jnp.float32(1.0))
    shift = jnp.where(is_sig, jnp.float32(0.5), jnp.float32(0.0))

    h = jnp.zeros((B, H2), f32)                      # [h_fwd | h_bwd]
    c = jnp.zeros((B, H2), f32)

    # ---- Fused fwd+bwd recurrence, fully unrolled (T static & small). ----
    # Per-step gx slices are 128-aligned lane slices (no sublane shuffles).
    for t in range(T):
        gates = gx_ref[:, t * G:(t + 1) * G] + jnp.dot(
            h, whh, preferred_element_type=f32)                  # (B, 8H)
        act = jnp.tanh(gates * scale) * scale + shift            # sig(f,i,o) | tanh(g)
        f_g = act[:, 0:H2]
        i_g = act[:, H2:2 * H2]
        o_g = act[:, 2 * H2:3 * H2]
        g_g = act[:, 3 * H2:4 * H2]
        c = f_g * c + i_g * g_g
        h = o_g * jnp.tanh(c)

    # h == torch.cat((hidden[0], hidden[1]), dim=1)
    rel = jnp.where(h >= 0, h, neg_slope * h)
    d1 = jnp.dot(rel, w1_ref[...], preferred_element_type=f32) + b1_ref[...]
    rel1 = jnp.where(d1 >= 0, d1, neg_slope * d1)
    out_ref[...] = (jnp.dot(rel1, w2_ref[...], preferred_element_type=f32)
                    + b2_ref[...])


def prepare_params(params, *, n_features, n_hidden, seq_len):
    """One-time folding of conv / im2col / direction fusion / gate layout.

    Depends only on the parameters; call ONCE and reuse the result across forward
    calls (keeps the folding HLOs off the per-call path)."""
    F, H, L = n_features, n_hidden, seq_len
    T = L - 1
    H2, G = 2 * H, 8 * H
    f32 = jnp.float32

    # torch LSTM gate order (i, f, g, o) -> fused kernel order (f, i, o, g) so that
    # elementwise partners in c = f*c + i*g, h = o*tanh(c) share 64-lane offsets.
    perm = jnp.array([1, 0, 3, 2])

    def lay_gate_vec(vec4h, direction):
        g = vec4h.reshape(4, H)[perm]                     # (4, H) fused gate order
        z = jnp.zeros((4, H), f32)
        pair = (g, z) if direction == 0 else (z, g)
        return jnp.stack(pair, axis=1).reshape(G)         # col = pos*2H + dir*H + j

    wlay_f = lay_gate_vec(params["w_ih_f"].reshape(4 * H), 0)
    wlay_b = lay_gate_vec(params["w_ih_b"].reshape(4 * H), 1)
    bias_col = (lay_gate_vec(params["b_ih_f"] + params["b_hh_f"], 0)
                + lay_gate_vec(params["b_ih_b"] + params["b_hh_b"], 1)
                + params["conv_b"][0] * (wlay_f + wlay_b))    # conv bias folded in

    # Conv1d(k=2, stride=1, no bias) as a matrix on x.reshape(B, F*L):
    #   c_mat[f*L + l, t] = w_conv[f,0]*d(l==t) + w_conv[f,1]*d(l==t+1)
    wc = params["conv_w"][0]                               # (F, 2)
    eye_l = jnp.eye(L, dtype=f32)
    c_mat = (wc[:, 0][:, None, None] * eye_l[None, :, :T]
             + wc[:, 1][:, None, None] * eye_l[None, :, 1:T + 1]).reshape(F * L, T)

    # All-step gate-input weights, both directions, lane-major output layout:
    #   w_big[t', t*8H + col] = d(t'==t)*wlay_f[col] + d(t'==T-1-t)*wlay_b[col]
    # (backward time reversal baked in).
    eye_t = jnp.eye(T, dtype=f32)
    w_big = (jnp.einsum("ut,c->utc", eye_t, wlay_f)
             + jnp.einsum("ut,c->utc", eye_t[:, ::-1], wlay_b)).reshape(T, T * G)
    bias_tile = jnp.tile(bias_col, T).reshape(1, T * G)

    def lay_whh(w_hh, direction):
        w = w_hh.T.reshape(H, 4, H)[:, perm, :]            # [j, pos, i]
        z = jnp.zeros((H, 4, H), f32)
        pair = (w, z) if direction == 0 else (z, w)
        return jnp.stack(pair, axis=2).reshape(H, G)

    whh_big = jnp.concatenate([lay_whh(params["w_hh_f"], 0),
                               lay_whh(params["w_hh_b"], 1)], axis=0)   # (2H, 8H)

    return dict(
        c_mat=c_mat, w_big=w_big, bias=bias_tile, whh=whh_big,
        w1=params["fc1_w"].T, b1=params["fc1_b"].reshape(1, -1),
        w2=params["fc2_w"].T, b2=params["fc2_b"].reshape(1, -1),
    )


def cnn_bilstm_forward(x, prep, *, n_hidden, seq_len, negative_slope=0.3):
    """Per-call path: a free contiguous reshape of x plus the pallas_call."""
    B = x.shape[0]
    T = seq_len - 1
    H = n_hidden
    G = 8 * H

    # Mirrors the module's sequences.view(B, n_features, -1) then flattens (F, L)
    # contiguously; no data movement.
    x_flat = x.reshape(B, -1)

    vmem = pl.BlockSpec(memory_space=pltpu.MemorySpace.VMEM)
    kernel = functools.partial(cnn_bilstm_kernel, seq_steps=T, n_hidden=H,
                               neg_slope=negative_slope)

    return pl.pallas_call(
        kernel,
        out_shape=jax.ShapeDtypeStruct((B, 1), jnp.float32),
        in_specs=[vmem] * 9,
        out_specs=vmem,
        scratch_shapes=[pltpu.VMEM((B, T * G), jnp.float32)],
    )(x_flat, prep["c_mat"], prep["w_big"], prep["bias"], prep["whh"],
      prep["w1"], prep["b1"], prep["w2"], prep["b2"])


def init_params(key, n_features, n_hidden):
    H = n_hidden
    ks = jax.random.split(key, 14)
    u = lambda k, shape, s=0.1: jax.random.uniform(k, shape, jnp.float32, -s, s)
    return {
        "conv_w": u(ks[0], (1, n_features, 2)),
        "conv_b": u(ks[1], (1,)),
        "w_ih_f": u(ks[2], (4 * H, 1)),
        "w_hh_f": u(ks[3], (4 * H, H)),
        "b_ih_f": u(ks[4], (4 * H,)),
        "b_hh_f": u(ks[5], (4 * H,)),
        "w_ih_b": u(ks[6], (4 * H, 1)),
        "w_hh_b": u(ks[7], (4 * H, H)),
        "b_ih_b": u(ks[8], (4 * H,)),
        "b_hh_b": u(ks[9], (4 * H,)),
        "fc1_w": u(ks[10], (H // 2, 2 * H)),
        "fc1_b": u(ks[11], (H // 2,)),
        "fc2_w": u(ks[12], (1, H // 2)),
        "fc2_b": u(ks[13], (1,)),
    }


def reference_forward(x, params, *, n_hidden, seq_len, negative_slope=0.3):
    """Pure-JAX mirror of the PyTorch forward (unfused), used as a correctness check."""
    B, F, L = x.shape
    T = seq_len - 1
    H = n_hidden
    w = params["conv_w"][0]                               # (F, 2)
    conv = (jnp.einsum("bft,f->bt", x[:, :, :T], w[:, 0]) +
            jnp.einsum("bft,f->bt", x[:, :, 1:T + 1], w[:, 1]) +
            params["conv_b"][0])                          # (B, T)

    def run_dir(seq, wih, whh, bih, bhh):
        def step(carry, xt):
            h, c = carry
            gates = xt[:, None] * wih[:, 0][None, :] + h @ whh.T + bih + bhh
            i = jax.nn.sigmoid(gates[:, 0:H])
            f = jax.nn.sigmoid(gates[:, H:2 * H])
            g = jnp.tanh(gates[:, 2 * H:3 * H])
            o = jax.nn.sigmoid(gates[:, 3 * H:4 * H])
            c = f * c + i * g
            h = o * jnp.tanh(c)
            return (h, c), None
        h0 = jnp.zeros((B, H), jnp.float32)
        (h, _), _ = lax.scan(step, (h0, h0), jnp.transpose(seq))
        return h

    h_f = run_dir(conv, params["w_ih_f"], params["w_hh_f"],
                  params["b_ih_f"], params["b_hh_f"])
    h_b = run_dir(conv[:, ::-1], params["w_ih_b"], params["w_hh_b"],
                  params["b_ih_b"], params["b_hh_b"])
    lr = lambda v: jnp.where(v >= 0, v, negative_slope * v)
    rel = lr(jnp.concatenate([h_f, h_b], axis=1))
    rel1 = lr(rel @ params["fc1_w"].T + params["fc1_b"])
    return rel1 @ params["fc2_w"].T + params["fc2_b"]


if __name__ == "__main__":
    B, n_features, n_hidden, seq_len = 2, 4, 32, 16   # n_layers effectively 1 (see note)
    key = jax.random.PRNGKey(0)
    kx, kp = jax.random.split(key)
    x = jax.random.normal(kx, (B, n_features, seq_len), jnp.float32)
    params = init_params(kp, n_features, n_hidden)

    # One-time weight folding (NOT on the per-call path).
    prep = prepare_params(params, n_features=n_features, n_hidden=n_hidden,
                          seq_len=seq_len)
    prep = jax.block_until_ready(prep)

    y = cnn_bilstm_forward(x, prep, n_hidden=n_hidden, seq_len=seq_len,
                           negative_slope=0.3)
    y = jax.block_until_ready(y)

    y_ref = reference_forward(x, params, n_hidden=n_hidden, seq_len=seq_len,
                              negative_slope=0.3)
    assert y.shape == (B, 1)
    # Tolerance documents the explicit precision choice: all dots (kernel and
    # reference) run at MXU DEFAULT precision (bf16 operand passes), and the
    # conv/direction/gate-layout folds change f32 summation order over 15 steps.
    assert jnp.allclose(y, y_ref, atol=1e-3, rtol=1e-3), (y, y_ref)
    print("KERNEL_OK")
</pallas_src>

<mosaic_0001>
module attributes {stable_mosaic.version = 11 : i64} {
  func.func @cnn_bilstm_kernel(%arg0: memref<2x64xf32, #tpu.memory_space<vmem>>, %arg1: memref<64x15xf32, #tpu.memory_space<vmem>>, %arg2: memref<15x3840xf32, #tpu.memory_space<vmem>>, %arg3: memref<1x3840xf32, #tpu.memory_space<vmem>>, %arg4: memref<64x256xf32, #tpu.memory_space<vmem>>, %arg5: memref<64x16xf32, #tpu.memory_space<vmem>>, %arg6: memref<1x16xf32, #tpu.memory_space<vmem>>, %arg7: memref<16x1xf32, #tpu.memory_space<vmem>>, %arg8: memref<1x1xf32, #tpu.memory_space<vmem>>, %arg9: memref<2x1xf32, #tpu.memory_space<vmem>>, %arg10: memref<2x3840xf32, #tpu.memory_space<vmem>>) attributes {dimension_semantics = [], scalar_prefetch = 0 : i64, scratch_operands = 1 : i64, tpu.core_type = #tpu.core_type<tc>} {
    %c0 = arith.constant 0 : index
    %c0_0 = arith.constant 0 : index
    %0 = vector.load %arg0[%c0, %c0_0] : memref<2x64xf32, #tpu.memory_space<vmem>>, vector<2x64xf32>
    %c0_1 = arith.constant 0 : index
    %c0_2 = arith.constant 0 : index
    %1 = vector.load %arg1[%c0_1, %c0_2] : memref<64x15xf32, #tpu.memory_space<vmem>>, vector<64x15xf32>
    %cst = arith.constant dense<0.000000e+00> : vector<2x15xf32>
    %2 = tpu.matmul %0, %1, %cst {dimension_numbers = #tpu.dot_dimension_numbers<[1], [0], [0], [1], [0, 0, 1, 1], [], []>} : vector<2x64xf32>, vector<64x15xf32>, vector<2x15xf32> -> vector<2x15xf32>
    %c0_3 = arith.constant 0 : index
    %c0_4 = arith.constant 0 : index
    %3 = vector.load %arg2[%c0_3, %c0_4] : memref<15x3840xf32, #tpu.memory_space<vmem>>, vector<15x3840xf32>
    %cst_5 = arith.constant dense<0.000000e+00> : vector<2x3840xf32>
    %4 = tpu.matmul %2, %3, %cst_5 {dimension_numbers = #tpu.dot_dimension_numbers<[1], [0], [0], [1], [0, 0, 1, 1], [], []>} : vector<2x15xf32>, vector<15x3840xf32>, vector<2x3840xf32> -> vector<2x3840xf32>
    %c0_6 = arith.constant 0 : index
    %c0_7 = arith.constant 0 : index
    %5 = vector.load %arg3[%c0_6, %c0_7] : memref<1x3840xf32, #tpu.memory_space<vmem>>, vector<1x3840xf32>
    %6 = vector.broadcast %5 : vector<1x3840xf32> to vector<2x3840xf32>
    %7 = arith.addf %4, %6 : vector<2x3840xf32>
    %c0_8 = arith.constant 0 : index
    %c0_9 = arith.constant 0 : index
    %8 = vector.load %arg10[%c0_8, %c0_9] : memref<2x3840xf32, #tpu.memory_space<vmem>>, vector<2x3840xf32>
    tpu.vector_store %arg10[%c0_8, %c0_9], %7 {strides = array<i32>} : memref<2x3840xf32, #tpu.memory_space<vmem>>, vector<2x3840xf32>,
    %c0_10 = arith.constant 0 : index
    %c0_11 = arith.constant 0 : index
    %9 = vector.load %arg4[%c0_10, %c0_11] : memref<64x256xf32, #tpu.memory_space<vmem>>, vector<64x256xf32>
    %10 = tpu.iota {dimensions = array<i32: 1>} : vector<1x256xi32>
    %c192_i32 = arith.constant 192 : i32
    %11 = vector.broadcast %c192_i32 : i32 to vector<1x256xi32>
    %12 = arith.cmpi slt, %10, %11 : vector<1x256xi32>
    %cst_12 = arith.constant 5.000000e-01 : f32
    %cst_13 = arith.constant 1.000000e+00 : f32
    %13 = vector.broadcast %cst_12 : f32 to vector<1x256xf32>
    %14 = vector.broadcast %cst_13 : f32 to vector<1x256xf32>
    %15 = arith.select %12, %13, %14 : vector<1x256xi1>, vector<1x256xf32>
    %cst_14 = arith.constant 5.000000e-01 : f32
    %cst_15 = arith.constant 0.000000e+00 : f32
    %16 = vector.broadcast %cst_14 : f32 to vector<1x256xf32>
    %17 = vector.broadcast %cst_15 : f32 to vector<1x256xf32>
    %18 = arith.select %12, %16, %17 : vector<1x256xi1>, vector<1x256xf32>
    %cst_16 = arith.constant 0.000000e+00 : f32
    %19 = vector.broadcast %cst_16 : f32 to vector<2x64xf32>
    %cst_17 = arith.constant 0.000000e+00 : f32
    %20 = vector.broadcast %cst_17 : f32 to vector<2x64xf32>
    %c0_18 = arith.constant 0 : index
    %c0_19 = arith.constant 0 : index
    %21 = vector.load %arg10[%c0_18, %c0_19] : memref<2x3840xf32, #tpu.memory_space<vmem>>, vector<2x256xf32>
    %cst_20 = arith.constant dense<0.000000e+00> : vector<2x256xf32>
    %22 = tpu.matmul %19, %9, %cst_20 {dimension_numbers = #tpu.dot_dimension_numbers<[1], [0], [0], [1], [0, 0, 1, 1], [], []>} : vector<2x64xf32>, vector<64x256xf32>, vector<2x256xf32> -> vector<2x256xf32>
    %23 = arith.addf %21, %22 : vector<2x256xf32>
    %24 = vector.broadcast %15 : vector<1x256xf32> to vector<2x256xf32>
    %25 = arith.mulf %23, %24 : vector<2x256xf32>
    %26 = math.tanh %25 : vector<2x256xf32>
    %27 = vector.broadcast %15 : vector<1x256xf32> to vector<2x256xf32>
    %28 = arith.mulf %26, %27 : vector<2x256xf32>
    %29 = vector.broadcast %18 : vector<1x256xf32> to vector<2x256xf32>
    %30 = arith.addf %28, %29 : vector<2x256xf32>
    %31 = vector.extract_strided_slice %30 {offsets = [0, 0], sizes = [2, 64], strides = [1, 1]} : vector<2x256xf32> to vector<2x64xf32>
    %32 = vector.extract_strided_slice %30 {offsets = [0, 64], sizes = [2, 64], strides = [1, 1]} : vector<2x256xf32> to vector<2x64xf32>
    %33 = vector.extract_strided_slice %30 {offsets = [0, 128], sizes = [2, 64], strides = [1, 1]} : vector<2x256xf32> to vector<2x64xf32>
    %34 = vector.extract_strided_slice %30 {offsets = [0, 192], sizes = [2, 64], strides = [1, 1]} : vector<2x256xf32> to vector<2x64xf32>
    %35 = arith.mulf %31, %20 : vector<2x64xf32>
    %36 = arith.mulf %32, %34 : vector<2x64xf32>
    %37 = arith.addf %35, %36 : vector<2x64xf32>
    %38 = math.tanh %37 : vector<2x64xf32>
    %39 = arith.mulf %33, %38 : vector<2x64xf32>
    %c0_21 = arith.constant 0 : index
    %c256 = arith.constant 256 : index
    %40 = vector.load %arg10[%c0_21, %c256] : memref<2x3840xf32, #tpu.memory_space<vmem>>, vector<2x256xf32>
    %cst_22 = arith.constant dense<0.000000e+00> : vector<2x256xf32>
    %41 = tpu.matmul %39, %9, %cst_22 {dimension_numbers = #tpu.dot_dimension_numbers<[1], [0], [0], [1], [0, 0, 1, 1], [], []>} : vector<2x64xf32>, vector<64x256xf32>, vector<2x256xf32> -> vector<2x256xf32>
    %42 = arith.addf %40, %41 : vector<2x256xf32>
    %43 = vector.broadcast %15 : vector<1x256xf32> to vector<2x256xf32>
    %44 = arith.mulf %42, %43 : vector<2x256xf32>
    %45 = math.tanh %44 : vector<2x256xf32>
    %46 = vector.broadcast %15 : vector<1x256xf32> to vector<2x256xf32>
    %47 = arith.mulf %45, %46 : vector<2x256xf32>
    %48 = vector.broadcast %18 : vector<1x256xf32> to vector<2x256xf32>
    %49 = arith.addf %47, %48 : vector<2x256xf32>
    %50 = vector.extract_strided_slice %49 {offsets = [0, 0], sizes = [2, 64], strides = [1, 1]} : vector<2x256xf32> to vector<2x64xf32>
    %51 = vector.extract_strided_slice %49 {offsets = [0, 64], sizes = [2, 64], strides = [1, 1]} : vector<2x256xf32> to vector<2x64xf32>
    %52 = vector.extract_strided_slice %49 {offsets = [0, 128], sizes = [2, 64], strides = [1, 1]} : vector<2x256xf32> to vector<2x64xf32>
    %53 = vector.extract_strided_slice %49 {offsets = [0, 192], sizes = [2, 64], strides = [1, 1]} : vector<2x256xf32> to vector<2x64xf32>
    %54 = arith.mulf %50, %37 : vector<2x64xf32>
    %55 = arith.mulf %51, %53 : vector<2x64xf32>
    %56 = arith.addf %54, %55 : vector<2x64xf32>
    %57 = math.tanh %56 : vector<2x64xf32>
    %58 = arith.mulf %52, %57 : vector<2x64xf32>
    %c0_23 = arith.constant 0 : index
    %c512 = arith.constant 512 : index
    %59 = vector.load %arg10[%c0_23, %c512] : memref<2x3840xf32, #tpu.memory_space<vmem>>, vector<2x256xf32>
    %cst_24 = arith.constant dense<0.000000e+00> : vector<2x256xf32>
    %60 = tpu.matmul %58, %9, %cst_24 {dimension_numbers = #tpu.dot_dimension_numbers<[1], [0], [0], [1], [0, 0, 1, 1], [], []>} : vector<2x64xf32>, vector<64x256xf32>, vector<2x256xf32> -> vector<2x256xf32>
    %61 = arith.addf %59, %60 : vector<2x256xf32>
    %62 = vector.broadcast %15 : vector<1x256xf32> to vector<2x256xf32>
    %63 = arith.mulf %61, %62 : vector<2x256xf32>
    %64 = math.tanh %63 : vector<2x256xf32>
    %65 = vector.broadcast %15 : vector<1x256xf32> to vector<2x256xf32>
    %66 = arith.mulf %64, %65 : vector<2x256xf32>
    %67 = vector.broadcast %18 : vector<1x256xf32> to vector<2x256xf32>
    %68 = arith.addf %66, %67 : vector<2x256xf32>
    %69 = vector.extract_strided_slice %68 {offsets = [0, 0], sizes = [2, 64], strides = [1, 1]} : vector<2x256xf32> to vector<2x64xf32>
    %70 = vector.extract_strided_slice %68 {offsets = [0, 64], sizes = [2, 64], strides = [1, 1]} : vector<2x256xf32> to vector<2x64xf32>
    %71 = vector.extract_strided_slice %68 {offsets = [0, 128], sizes = [2, 64], strides = [1, 1]} : vector<2x256xf32> to vector<2x64xf32>
    %72 = vector.extract_strided_slice %68 {offsets = [0, 192], sizes = [2, 64], strides = [1, 1]} : vector<2x256xf32> to vector<2x64xf32>
    %73 = arith.mulf %69, %56 : vector<2x64xf32>
    %74 = arith.mulf %70, %72 : vector<2x64xf32>
    %75 = arith.addf %73, %74 : vector<2x64xf32>
    %76 = math.tanh %75 : vector<2x64xf32>
    %77 = arith.mulf %71, %76 : vector<2x64xf32>
    %c0_25 = arith.constant 0 : index
    %c768 = arith.constant 768 : index
    %78 = vector.load %arg10[%c0_25, %c768] : memref<2x3840xf32, #tpu.memory_space<vmem>>, vector<2x256xf32>
    %cst_26 = arith.constant dense<0.000000e+00> : vector<2x256xf32>
    %79 = tpu.matmul %77, %9, %cst_26 {dimension_numbers = #tpu.dot_dimension_numbers<[1], [0], [0], [1], [0, 0, 1, 1], [], []>} : vector<2x64xf32>, vector<64x256xf32>, vector<2x256xf32> -> vector<2x256xf32>
    %80 = arith.addf %78, %79 : vector<2x256xf32>
    %81 = vector.broadcast %15 : vector<1x256xf32> to vector<2x256xf32>
    %82 = arith.mulf %80, %81 : vector<2x256xf32>
    %83 = math.tanh %82 : vector<2x256xf32>
    %84 = vector.broadcast %15 : vector<1x256xf32> to vector<2x256xf32>
    %85 = arith.mulf %83, %84 : vector<2x256xf32>
    %86 = vector.broadcast %18 : vector<1x256xf32> to vector<2x256xf32>
    %87 = arith.addf %85, %86 : vector<2x256xf32>
    %88 = vector.extract_strided_slice %87 {offsets = [0, 0], sizes = [2, 64], strides = [1, 1]} : vector<2x256xf32> to vector<2x64xf32>
    %89 = vector.extract_strided_slice %87 {offsets = [0, 64], sizes = [2, 64], strides = [1, 1]} : vector<2x256xf32> to vector<2x64xf32>
    %90 = vector.extract_strided_slice %87 {offsets = [0, 128], sizes = [2, 64], strides = [1, 1]} : vector<2x256xf32> to vector<2x64xf32>
    %91 = vector.extract_strided_slice %87 {offsets = [0, 192], sizes = [2, 64], strides = [1, 1]} : vector<2x256xf32> to vector<2x64xf32>
    %92 = arith.mulf %88, %75 : vector<2x64xf32>
    %93 = arith.mulf %89, %91 : vector<2x64xf32>
    %94 = arith.addf %92, %93 : vector<2x64xf32>
    %95 = math.tanh %94 : vector<2x64xf32>
    %96 = arith.mulf %90, %95 : vector<2x64xf32>
    %c0_27 = arith.constant 0 : index
    %c1024 = arith.constant 1024 : index
    %97 = vector.load %arg10[%c0_27, %c1024] : memref<2x3840xf32, #tpu.memory_space<vmem>>, vector<2x256xf32>
    %cst_28 = arith.constant dense<0.000000e+00> : vector<2x256xf32>
    %98 = tpu.matmul %96, %9, %cst_28 {dimension_numbers = #tpu.dot_dimension_numbers<[1], [0], [0], [1], [0, 0, 1, 1], [], []>} : vector<2x64xf32>, vector<64x256xf32>, vector<2x256xf32> -> vector<2x256xf32>
    %99 = arith.addf %97, %98 : vector<2x256xf32>
    %100 = vector.broadcast %15 : vector<1x256xf32> to vector<2x256xf32>
    %101 = arith.mulf %99, %100 : vector<2x256xf32>
    %102 = math.tanh %101 : vector<2x256xf32>
    %103 = vector.broadcast %15 : vector<1x256xf32> to vector<2x256xf32>
    %104 = arith.mulf %102, %103 : vector<2x256xf32>
    %105 = vector.broadcast %18 : vector<1x256xf32> to vector<2x256xf32>
    %106 = arith.addf %104, %105 : vector<2x256xf32>
    %107 = vector.extract_strided_slice %106 {offsets = [0, 0], sizes = [2, 64], strides = [1, 1]} : vector<2x256xf32> to vector<2x64xf32>
    %108 = vector.extract_strided_slice %106 {offsets = [0, 64], sizes = [2, 64], strides = [1, 1]} : vector<2x256xf32> to vector<2x64xf32>
    %109 = vector.extract_strided_slice %106 {offsets = [0, 128], sizes = [2, 64], strides = [1, 1]} : vector<2x256xf32> to vector<2x64xf32>
    %110 = vector.extract_strided_slice %106 {offsets = [0, 192], sizes = [2, 64], strides = [1, 1]} : vector<2x256xf32> to vector<2x64xf32>
    %111 = arith.mulf %107, %94 : vector<2x64xf32>
    %112 = arith.mulf %108, %110 : vector<2x64xf32>
    %113 = arith.addf %111, %112 : vector<2x64xf32>
    %114 = math.tanh %113 : vector<2x64xf32>
    %115 = arith.mulf %109, %114 : vector<2x64xf32>
    %c0_29 = arith.constant 0 : index
    %c1280 = arith.constant 1280 : index
    %116 = vector.load %arg10[%c0_29, %c1280] : memref<2x3840xf32, #tpu.memory_space<vmem>>, vector<2x256xf32>
    %cst_30 = arith.constant dense<0.000000e+00> : vector<2x256xf32>
    %117 = tpu.matmul %115, %9, %cst_30 {dimension_numbers = #tpu.dot_dimension_numbers<[1], [0], [0], [1], [0, 0, 1, 1], [], []>} : vector<2x64xf32>, vector<64x256xf32>, vector<2x256xf32> -> vector<2x256xf32>
    %118 = arith.addf %116, %117 : vector<2x256xf32>
    %119 = vector.broadcast %15 : vector<1x256xf32> to vector<2x256xf32>
    %120 = arith.mulf %118, %119 : vector<2x256xf32>
    %121 = math.tanh %120 : vector<2x256xf32>
    %122 = vector.broadcast %15 : vector<1x256xf32> to vector<2x256xf32>
    %123 = arith.mulf %121, %122 : vector<2x256xf32>
    %124 = vector.broadcast %18 : vector<1x256xf32> to vector<2x256xf32>
    %125 = arith.addf %123, %124 : vector<2x256xf32>
    %126 = vector.extract_strided_slice %125 {offsets = [0, 0], sizes = [2, 64], strides = [1, 1]} : vector<2x256xf32> to vector<2x64xf32>
    %127 = vector.extract_strided_slice %125 {offsets = [0, 64], sizes = [2, 64], strides = [1, 1]} : vector<2x256xf32> to vector<2x64xf32>
    %128 = vector.extract_strided_slice %125 {offsets = [0, 128], sizes = [2, 64], strides = [1, 1]} : vector<2x256xf32> to vector<2x64xf32>
    %129 = vector.extract_strided_slice %125 {offsets = [0, 192], sizes = [2, 64], strides = [1, 1]} : vector<2x256xf32> to vector<2x64xf32>
    %130 = arith.mulf %126, %113 : vector<2x64xf32>
    %131 = arith.mulf %127, %129 : vector<2x64xf32>
    %132 = arith.addf %130, %131 : vector<2x64xf32>
    %133 = math.tanh %132 : vector<2x64xf32>
    %134 = arith.mulf %128, %133 : vector<2x64xf32>
    %c0_31 = arith.constant 0 : index
    %c1536 = arith.constant 1536 : index
    %135 = vector.load %arg10[%c0_31, %c1536] : memref<2x3840xf32, #tpu.memory_space<vmem>>, vector<2x256xf32>
    %cst_32 = arith.constant dense<0.000000e+00> : vector<2x256xf32>
    %136 = tpu.matmul %134, %9, %cst_32 {dimension_numbers = #tpu.dot_dimension_numbers<[1], [0], [0], [1], [0, 0, 1, 1], [], []>} : vector<2x64xf32>, vector<64x256xf32>, vector<2x256xf32> -> vector<2x256xf32>
    %137 = arith.addf %135, %136 : vector<2x256xf32>
    %138 = vector.broadcast %15 : vector<1x256xf32> to vector<2x256xf32>
    %139 = arith.mulf %137, %138 : vector<2x256xf32>
    %140 = math.tanh %139 : vector<2x256xf32>
    %141 = vector.broadcast %15 : vector<1x256xf32> to vector<2x256xf32>
    %142 = arith.mulf %140, %141 : vector<2x256xf32>
    %143 = vector.broadcast %18 : vector<1x256xf32> to vector<2x256xf32>
    %144 = arith.addf %142, %143 : vector<2x256xf32>
    %145 = vector.extract_strided_slice %144 {offsets = [0, 0], sizes = [2, 64], strides = [1, 1]} : vector<2x256xf32> to vector<2x64xf32>
    %146 = vector.extract_strided_slice %144 {offsets = [0, 64], sizes = [2, 64], strides = [1, 1]} : vector<2x256xf32> to vector<2x64xf32>
    %147 = vector.extract_strided_slice %144 {offsets = [0, 128], sizes = [2, 64], strides = [1, 1]} : vector<2x256xf32> to vector<2x64xf32>
    %148 = vector.extract_strided_slice %144 {offsets = [0, 192], sizes = [2, 64], strides = [1, 1]} : vector<2x256xf32> to vector<2x64xf32>
    %149 = arith.mulf %145, %132 : vector<2x64xf32>
    %150 = arith.mulf %146, %148 : vector<2x64xf32>
    %151 = arith.addf %149, %150 : vector<2x64xf32>
    %152 = math.tanh %151 : vector<2x64xf32>
    %153 = arith.mulf %147, %152 : vector<2x64xf32>
    %c0_33 = arith.constant 0 : index
    %c1792 = arith.constant 1792 : index
    %154 = vector.load %arg10[%c0_33, %c1792] : memref<2x3840xf32, #tpu.memory_space<vmem>>, vector<2x256xf32>
    %cst_34 = arith.constant dense<0.000000e+00> : vector<2x256xf32>
    %155 = tpu.matmul %153, %9, %cst_34 {dimension_numbers = #tpu.dot_dimension_numbers<[1], [0], [0], [1], [0, 0, 1, 1], [], []>} : vector<2x64xf32>, vector<64x256xf32>, vector<2x256xf32> -> vector<2x256xf32>
    %156 = arith.addf %154, %155 : vector<2x256xf32>
    %157 = vector.broadcast %15 : vector<1x256xf32> to vector<2x256xf32>
    %158 = arith.mulf %156, %157 : vector<2x256xf32>
    %159 = math.tanh %158 : vector<2x256xf32>
    %160 = vector.broadcast %15 : vector<1x256xf32> to vector<2x256xf32>
    %161 = arith.mulf %159, %160 : vector<2x256xf32>
    %162 = vector.broadcast %18 : vector<1x256xf32> to vector<2x256xf32>
    %163 = arith.addf %161, %162 : vector<2x256xf32>
    %164 = vector.extract_strided_slice %163 {offsets = [0, 0], sizes = [2, 64], strides = [1, 1]} : vector<2x256xf32> to vector<2x64xf32>
    %165 = vector.extract_strided_slice %163 {offsets = [0, 64], sizes = [2, 64], strides = [1, 1]} : vector<2x256xf32> to vector<2x64xf32>
    %166 = vector.extract_strided_slice %163 {offsets = [0, 128], sizes = [2, 64], strides = [1, 1]} : vector<2x256xf32> to vector<2x64xf32>
    %167 = vector.extract_strided_slice %163 {offsets = [0, 192], sizes = [2, 64], strides = [1, 1]} : vector<2x256xf32> to vector<2x64xf32>
    %168 = arith.mulf %164, %151 : vector<2x64xf32>
    %169 = arith.mulf %165, %167 : vector<2x64xf32>
    %170 = arith.addf %168, %169 : vector<2x64xf32>
    %171 = math.tanh %170 : vector<2x64xf32>
    %172 = arith.mulf %166, %171 : vector<2x64xf32>
    %c0_35 = arith.constant 0 : index
    %c2048 = arith.constant 2048 : index
    %173 = vector.load %arg10[%c0_35, %c2048] : memref<2x3840xf32, #tpu.memory_space<vmem>>, vector<2x256xf32>
    %cst_36 = arith.constant dense<0.000000e+00> : vector<2x256xf32>
    %174 = tpu.matmul %172, %9, %cst_36 {dimension_numbers = #tpu.dot_dimension_numbers<[1], [0], [0], [1], [0, 0, 1, 1], [], []>} : vector<2x64xf32>, vector<64x256xf32>, vector<2x256xf32> -> vector<2x256xf32>
    %175 = arith.addf %173, %174 : vector<2x256xf32>
    %176 = vector.broadcast %15 : vector<1x256xf32> to vector<2x256xf32>
    %177 = arith.mulf %175, %176 : vector<2x256xf32>
    %178 = math.tanh %177 : vector<2x256xf32>
    %179 = vector.broadcast %15 : vector<1x256xf32> to vector<2x256xf32>
    %180 = arith.mulf %178, %179 : vector<2x256xf32>
    %181 = vector.broadcast %18 : vector<1x256xf32> to vector<2x256xf32>
    %182 = arith.addf %180, %181 : vector<2x256xf32>
    %183 = vector.extract_strided_slice %182 {offsets = [0, 0], sizes = [2, 64], strides = [1, 1]} : vector<2x256xf32> to vector<2x64xf32>
    %184 = vector.extract_strided_slice %182 {offsets = [0, 64], sizes = [2, 64], strides = [1, 1]} : vector<2x256xf32> to vector<2x64xf32>
    %185 = vector.extract_strided_slice %182 {offsets = [0, 128], sizes = [2, 64], strides = [1, 1]} : vector<2x256xf32> to vector<2x64xf32>
    %186 = vector.extract_strided_slice %182 {offsets = [0, 192], sizes = [2, 64], strides = [1, 1]} : vector<2x256xf32> to vector<2x64xf32>
    %187 = arith.mulf %183, %170 : vector<2x64xf32>
    %188 = arith.mulf %184, %186 : vector<2x64xf32>
    %189 = arith.addf %187, %188 : vector<2x64xf32>
    %190 = math.tanh %189 : vector<2x64xf32>
    %191 = arith.mulf %185, %190 : vector<2x64xf32>
    %c0_37 = arith.constant 0 : index
    %c2304 = arith.constant 2304 : index
    %192 = vector.load %arg10[%c0_37, %c2304] : memref<2x3840xf32, #tpu.memory_space<vmem>>, vector<2x256xf32>
    %cst_38 = arith.constant dense<0.000000e+00> : vector<2x256xf32>
    %193 = tpu.matmul %191, %9, %cst_38 {dimension_numbers = #tpu.dot_dimension_numbers<[1], [0], [0], [1], [0, 0, 1, 1], [], []>} : vector<2x64xf32>, vector<64x256xf32>, vector<2x256xf32> -> vector<2x256xf32>
    %194 = arith.addf %192, %193 : vector<2x256xf32>
    %195 = vector.broadcast %15 : vector<1x256xf32> to vector<2x256xf32>
    %196 = arith.mulf %194, %195 : vector<2x256xf32>
    %197 = math.tanh %196 : vector<2x256xf32>
    %198 = vector.broadcast %15 : vector<1x256xf32> to vector<2x256xf32>
    %199 = arith.mulf %197, %198 : vector<2x256xf32>
    %200 = vector.broadcast %18 : vector<1x256xf32> to vector<2x256xf32>
    %201 = arith.addf %199, %200 : vector<2x256xf32>
    %202 = vector.extract_strided_slice %201 {offsets = [0, 0], sizes = [2, 64], strides = [1, 1]} : vector<2x256xf32> to vector<2x64xf32>
    %203 = vector.extract_strided_slice %201 {offsets = [0, 64], sizes = [2, 64], strides = [1, 1]} : vector<2x256xf32> to vector<2x64xf32>
    %204 = vector.extract_strided_slice %201 {offsets = [0, 128], sizes = [2, 64], strides = [1, 1]} : vector<2x256xf32> to vector<2x64xf32>
    %205 = vector.extract_strided_slice %201 {offsets = [0, 192], sizes = [2, 64], strides = [1, 1]} : vector<2x256xf32> to vector<2x64xf32>
    %206 = arith.mulf %202, %189 : vector<2x64xf32>
    %207 = arith.mulf %203, %205 : vector<2x64xf32>
    %208 = arith.addf %206, %207 : vector<2x64xf32>
    %209 = math.tanh %208 : vector<2x64xf32>
    %210 = arith.mulf %204, %209 : vector<2x64xf32>
    %c0_39 = arith.constant 0 : index
    %c2560 = arith.constant 2560 : index
    %211 = vector.load %arg10[%c0_39, %c2560] : memref<2x3840xf32, #tpu.memory_space<vmem>>, vector<2x256xf32>
    %cst_40 = arith.constant dense<0.000000e+00> : vector<2x256xf32>
    %212 = tpu.matmul %210, %9, %cst_40 {dimension_numbers = #tpu.dot_dimension_numbers<[1], [0], [0], [1], [0, 0, 1, 1], [], []>} : vector<2x64xf32>, vector<64x256xf32>, vector<2x256xf32> -> vector<2x256xf32>
    %213 = arith.addf %211, %212 : vector<2x256xf32>
    %214 = vector.broadcast %15 : vector<1x256xf32> to vector<2x256xf32>
    %215 = arith.mulf %213, %214 : vector<2x256xf32>
    %216 = math.tanh %215 : vector<2x256xf32>
    %217 = vector.broadcast %15 : vector<1x256xf32> to vector<2x256xf32>
    %218 = arith.mulf %216, %217 : vector<2x256xf32>
    %219 = vector.broadcast %18 : vector<1x256xf32> to vector<2x256xf32>
    %220 = arith.addf %218, %219 : vector<2x256xf32>
    %221 = vector.extract_strided_slice %220 {offsets = [0, 0], sizes = [2, 64], strides = [1, 1]} : vector<2x256xf32> to vector<2x64xf32>
    %222 = vector.extract_strided_slice %220 {offsets = [0, 64], sizes = [2, 64], strides = [1, 1]} : vector<2x256xf32> to vector<2x64xf32>
    %223 = vector.extract_strided_slice %220 {offsets = [0, 128], sizes = [2, 64], strides = [1, 1]} : vector<2x256xf32> to vector<2x64xf32>
    %224 = vector.extract_strided_slice %220 {offsets = [0, 192], sizes = [2, 64], strides = [1, 1]} : vector<2x256xf32> to vector<2x64xf32>
    %225 = arith.mulf %221, %208 : vector<2x64xf32>
    %226 = arith.mulf %222, %224 : vector<2x64xf32>
    %227 = arith.addf %225, %226 : vector<2x64xf32>
    %228 = math.tanh %227 : vector<2x64xf32>
    %229 = arith.mulf %223, %228 : vector<2x64xf32>
    %c0_41 = arith.constant 0 : index
    %c2816 = arith.constant 2816 : index
    %230 = vector.load %arg10[%c0_41, %c2816] : memref<2x3840xf32, #tpu.memory_space<vmem>>, vector<2x256xf32>
    %cst_42 = arith.constant dense<0.000000e+00> : vector<2x256xf32>
    %231 = tpu.matmul %229, %9, %cst_42 {dimension_numbers = #tpu.dot_dimension_numbers<[1], [0], [0], [1], [0, 0, 1, 1], [], []>} : vector<2x64xf32>, vector<64x256xf32>, vector<2x256xf32> -> vector<2x256xf32>
    %232 = arith.addf %230, %231 : vector<2x256xf32>
    %233 = vector.broadcast %15 : vector<1x256xf32> to vector<2x256xf32>
    %234 = arith.mulf %232, %233 : vector<2x256xf32>
    %235 = math.tanh %234 : vector<2x256xf32>
    %236 = vector.broadcast %15 : vector<1x256xf32> to vector<2x256xf32>
    %237 = arith.mulf %235, %236 : vector<2x256xf32>
    %238 = vector.broadcast %18 : vector<1x256xf32> to vector<2x256xf32>
    %239 = arith.addf %237, %238 : vector<2x256xf32>
    %240 = vector.extract_strided_slice %239 {offsets = [0, 0], sizes = [2, 64], strides = [1, 1]} : vector<2x256xf32> to vector<2x64xf32>
    %241 = vector.extract_strided_slice %239 {offsets = [0, 64], sizes = [2, 64], strides = [1, 1]} : vector<2x256xf32> to vector<2x64xf32>
    %242 = vector.extract_strided_slice %239 {offsets = [0, 128], sizes = [2, 64], strides = [1, 1]} : vector<2x256xf32> to vector<2x64xf32>
    %243 = vector.extract_strided_slice %239 {offsets = [0, 192], sizes = [2, 64], strides = [1, 1]} : vector<2x256xf32> to vector<2x64xf32>
    %244 = arith.mulf %240, %227 : vector<2x64xf32>
    %245 = arith.mulf %241, %243 : vector<2x64xf32>
    %246 = arith.addf %244, %245 : vector<2x64xf32>
    %247 = math.tanh %246 : vector<2x64xf32>
    %248 = arith.mulf %242, %247 : vector<2x64xf32>
    %c0_43 = arith.constant 0 : index
    %c3072 = arith.constant 3072 : index
    %249 = vector.load %arg10[%c0_43, %c3072] : memref<2x3840xf32, #tpu.memory_space<vmem>>, vector<2x256xf32>
    %cst_44 = arith.constant dense<0.000000e+00> : vector<2x256xf32>
    %250 = tpu.matmul %248, %9, %cst_44 {dimension_numbers = #tpu.dot_dimension_numbers<[1], [0], [0], [1], [0, 0, 1, 1], [], []>} : vector<2x64xf32>, vector<64x256xf32>, vector<2x256xf32> -> vector<2x256xf32>
    %251 = arith.addf %249, %250 : vector<2x256xf32>
    %252 = vector.broadcast %15 : vector<1x256xf32> to vector<2x256xf32>
    %253 = arith.mulf %251, %252 : vector<2x256xf32>
    %254 = math.tanh %253 : vector<2x256xf32>
    %255 = vector.broadcast %15 : vector<1x256xf32> to vector<2x256xf32>
    %256 = arith.mulf %254, %255 : vector<2x256xf32>
    %257 = vector.broadcast %18 : vector<1x256xf32> to vector<2x256xf32>
    %258 = arith.addf %256, %257 : vector<2x256xf32>
    %259 = vector.extract_strided_slice %258 {offsets = [0, 0], sizes = [2, 64], strides = [1, 1]} : vector<2x256xf32> to vector<2x64xf32>
    %260 = vector.extract_strided_slice %258 {offsets = [0, 64], sizes = [2, 64], strides = [1, 1]} : vector<2x256xf32> to vector<2x64xf32>
    %261 = vector.extract_strided_slice %258 {offsets = [0, 128], sizes = [2, 64], strides = [1, 1]} : vector<2x256xf32> to vector<2x64xf32>
    %262 = vector.extract_strided_slice %258 {offsets = [0, 192], sizes = [2, 64], strides = [1, 1]} : vector<2x256xf32> to vector<2x64xf32>
    %263 = arith.mulf %259, %246 : vector<2x64xf32>
    %264 = arith.mulf %260, %262 : vector<2x64xf32>
    %265 = arith.addf %263, %264 : vector<2x64xf32>
    %266 = math.tanh %265 : vector<2x64xf32>
    %267 = arith.mulf %261, %266 : vector<2x64xf32>
    %c0_45 = arith.constant 0 : index
    %c3328 = arith.constant 3328 : index
    %268 = vector.load %arg10[%c0_45, %c3328] : memref<2x3840xf32, #tpu.memory_space<vmem>>, vector<2x256xf32>
    %cst_46 = arith.constant dense<0.000000e+00> : vector<2x256xf32>
    %269 = tpu.matmul %267, %9, %cst_46 {dimension_numbers = #tpu.dot_dimension_numbers<[1], [0], [0], [1], [0, 0, 1, 1], [], []>} : vector<2x64xf32>, vector<64x256xf32>, vector<2x256xf32> -> vector<2x256xf32>
    %270 = arith.addf %268, %269 : vector<2x256xf32>
    %271 = vector.broadcast %15 : vector<1x256xf32> to vector<2x256xf32>
    %272 = arith.mulf %270, %271 : vector<2x256xf32>
    %273 = math.tanh %272 : vector<2x256xf32>
    %274 = vector.broadcast %15 : vector<1x256xf32> to vector<2x256xf32>
    %275 = arith.mulf %273, %274 : vector<2x256xf32>
    %276 = vector.broadcast %18 : vector<1x256xf32> to vector<2x256xf32>
    %277 = arith.addf %275, %276 : vector<2x256xf32>
    %278 = vector.extract_strided_slice %277 {offsets = [0, 0], sizes = [2, 64], strides = [1, 1]} : vector<2x256xf32> to vector<2x64xf32>
    %279 = vector.extract_strided_slice %277 {offsets = [0, 64], sizes = [2, 64], strides = [1, 1]} : vector<2x256xf32> to vector<2x64xf32>
    %280 = vector.extract_strided_slice %277 {offsets = [0, 128], sizes = [2, 64], strides = [1, 1]} : vector<2x256xf32> to vector<2x64xf32>
    %281 = vector.extract_strided_slice %277 {offsets = [0, 192], sizes = [2, 64], strides = [1, 1]} : vector<2x256xf32> to vector<2x64xf32>
    %282 = arith.mulf %278, %265 : vector<2x64xf32>
    %283 = arith.mulf %279, %281 : vector<2x64xf32>
    %284 = arith.addf %282, %283 : vector<2x64xf32>
    %285 = math.tanh %284 : vector<2x64xf32>
    %286 = arith.mulf %280, %285 : vector<2x64xf32>
    %c0_47 = arith.constant 0 : index
    %c3584 = arith.constant 3584 : index
    %287 = vector.load %arg10[%c0_47, %c3584] : memref<2x3840xf32, #tpu.memory_space<vmem>>, vector<2x256xf32>
    %cst_48 = arith.constant dense<0.000000e+00> : vector<2x256xf32>
    %288 = tpu.matmul %286, %9, %cst_48 {dimension_numbers = #tpu.dot_dimension_numbers<[1], [0], [0], [1], [0, 0, 1, 1], [], []>} : vector<2x64xf32>, vector<64x256xf32>, vector<2x256xf32> -> vector<2x256xf32>
    %289 = arith.addf %287, %288 : vector<2x256xf32>
    %290 = vector.broadcast %15 : vector<1x256xf32> to vector<2x256xf32>
    %291 = arith.mulf %289, %290 : vector<2x256xf32>
    %292 = math.tanh %291 : vector<2x256xf32>
    %293 = vector.broadcast %15 : vector<1x256xf32> to vector<2x256xf32>
    %294 = arith.mulf %292, %293 : vector<2x256xf32>
    %295 = vector.broadcast %18 : vector<1x256xf32> to vector<2x256xf32>
    %296 = arith.addf %294, %295 : vector<2x256xf32>
    %297 = vector.extract_strided_slice %296 {offsets = [0, 0], sizes = [2, 64], strides = [1, 1]} : vector<2x256xf32> to vector<2x64xf32>
    %298 = vector.extract_strided_slice %296 {offsets = [0, 64], sizes = [2, 64], strides = [1, 1]} : vector<2x256xf32> to vector<2x64xf32>
    %299 = vector.extract_strided_slice %296 {offsets = [0, 128], sizes = [2, 64], strides = [1, 1]} : vector<2x256xf32> to vector<2x64xf32>
    %300 = vector.extract_strided_slice %296 {offsets = [0, 192], sizes = [2, 64], strides = [1, 1]} : vector<2x256xf32> to vector<2x64xf32>
    %301 = arith.mulf %297, %284 : vector<2x64xf32>
    %302 = arith.mulf %298, %300 : vector<2x64xf32>
    %303 = arith.addf %301, %302 : vector<2x64xf32>
    %304 = math.tanh %303 : vector<2x64xf32>
    %305 = arith.mulf %299, %304 : vector<2x64xf32>
    %cst_49 = arith.constant 0.000000e+00 : f32
    %306 = vector.broadcast %cst_49 : f32 to vector<2x64xf32>
    %307 = arith.cmpf oge, %305, %306 : vector<2x64xf32>
    %cst_50 = arith.constant 3.000000e-01 : f32
    %308 = vector.broadcast %cst_50 : f32 to vector<2x64xf32>
    %309 = arith.mulf %308, %305 : vector<2x64xf32>
    %310 = arith.select %307, %305, %309 : vector<2x64xi1>, vector<2x64xf32>
    %c0_51 = arith.constant 0 : index
    %c0_52 = arith.constant 0 : index
    %311 = vector.load %arg5[%c0_51, %c0_52] : memref<64x16xf32, #tpu.memory_space<vmem>>, vector<64x16xf32>
    %cst_53 = arith.constant dense<0.000000e+00> : vector<2x16xf32>
    %312 = tpu.matmul %310, %311, %cst_53 {dimension_numbers = #tpu.dot_dimension_numbers<[1], [0], [0], [1], [0, 0, 1, 1], [], []>} : vector<2x64xf32>, vector<64x16xf32>, vector<2x16xf32> -> vector<2x16xf32>
    %c0_54 = arith.constant 0 : index
    %c0_55 = arith.constant 0 : index
    %313 = vector.load %arg6[%c0_54, %c0_55] : memref<1x16xf32, #tpu.memory_space<vmem>>, vector<1x16xf32>
    %314 = vector.broadcast %313 : vector<1x16xf32> to vector<2x16xf32>
    %315 = arith.addf %312, %314 : vector<2x16xf32>
    %cst_56 = arith.constant 0.000000e+00 : f32
    %316 = vector.broadcast %cst_56 : f32 to vector<2x16xf32>
    %317 = arith.cmpf oge, %315, %316 : vector<2x16xf32>
    %cst_57 = arith.constant 3.000000e-01 : f32
    %318 = vector.broadcast %cst_57 : f32 to vector<2x16xf32>
    %319 = arith.mulf %318, %315 : vector<2x16xf32>
    %320 = arith.select %317, %315, %319 : vector<2x16xi1>, vector<2x16xf32>
    %c0_58 = arith.constant 0 : index
    %c0_59 = arith.constant 0 : index
    %321 = vector.load %arg7[%c0_58, %c0_59] : memref<16x1xf32, #tpu.memory_space<vmem>>, vector<16x1xf32>
    %cst_60 = arith.constant dense<0.000000e+00> : vector<2x1xf32>
    %322 = tpu.matmul %320, %321, %cst_60 {dimension_numbers = #tpu.dot_dimension_numbers<[1], [0], [0], [1], [0, 0, 1, 1], [], []>} : vector<2x16xf32>, vector<16x1xf32>, vector<2x1xf32> -> vector<2x1xf32>
    %c0_61 = arith.constant 0 : index
    %c0_62 = arith.constant 0 : index
    %323 = vector.load %arg8[%c0_61, %c0_62] : memref<1x1xf32, #tpu.memory_space<vmem>>, vector<1x1xf32>
    %324 = vector.broadcast %323 : vector<1x1xf32> to vector<2x1xf32>
    %325 = arith.addf %322, %324 : vector<2x1xf32>
    %c0_63 = arith.constant 0 : index
    %c0_64 = arith.constant 0 : index
    %326 = vector.load %arg9[%c0_63, %c0_64] : memref<2x1xf32, #tpu.memory_space<vmem>>, vector<2x1xf32>
    tpu.vector_store %arg9[%c0_63, %c0_64], %325 {strides = array<i32>} : memref<2x1xf32, #tpu.memory_space<vmem>>, vector<2x1xf32>,
    return
  }
}

</mosaic_0001>

<bundles_post_ra>
// kernel: tpu_custom_call.1
= control target key start
LH: loop header
LB: loop body
LE: loop exit
PB: predicated region body
PF: predicated region fallthrough
CT: control target
= control target key end

     0   :  { %s3104_s0 = inlined_call_operand.vmem [shape: f32[2,64], index: 0, kind: input, shape index: {}]   ;;  %s3105_s1 = inlined_call_operand.vmem [shape: f32[64,15], index: 1, kind: input, shape index: {}]   ;;  %s3106_s2 = inlined_call_operand.hbm [shape: f32[15,3840], index: 2, kind: input, shape index: {}]   ;;  %s3107_s3 = inlined_call_operand.hbm [shape: f32[1,3840], index: 3, kind: input, shape index: {}]   ;;  %s3108_s4 = inlined_call_operand.vmem [shape: f32[64,256], index: 4, kind: input, shape index: {}]   ;;  %s3109_s5 = inlined_call_operand.vmem [shape: f32[64,16], index: 5, kind: input, shape index: {}]   ;;  %s3110_s6 = inlined_call_operand.vmem [shape: f32[1,16], index: 6, kind: input, shape index: {}]   ;;  %s3111_s7 = inlined_call_operand.vmem [shape: f32[16,1], index: 7, kind: input, shape index: {}]   ;;  %s3112_s8 = inlined_call_operand.<no memory space> [shape: f32[1,1], index: 8, kind: input, shape index: {}]   ;;  %s3113_s9 = inlined_call_operand.vmem [shape: f32[2,1], index: 9, kind: output, shape index: {}]  }
   0x1   :  { %v14_v0 = vstv %s3112_s8 }
   0x2   :  { %15 = vst [vmem:[#allocation3] sm:$0x1] %v14_v0 }
   0x3   :  { %16 = vsyncpa [#allocation5], 0  ;;  %s26_s13 = sshll.u32 %s3106_s2, 4  ;;  %s27_s13 = int_to_ptr.hbm [resolvable:$true] %s26_s13 }
   0x4   :  { %17 = vsyncpa [#allocation7], 0  ;;  %s2345_s14 = smov [#allocation4]   ;;  %s40_s18 = sshll.u32 %s3107_s3, 4  ;;  %s41_s18 = int_to_ptr.hbm [resolvable:$true] %s40_s18 }
   0x5   :  { %s28_s15 = sshll.u32 %s2345_s14, 4  ;;  %s2346_s19 = smov 3840   ;;  %s29_s15 = int_to_ptr.vmem [resolvable:$true] %s28_s15 }
   0x6   :  { %s2347_s20 = smov 240   ;;  %s2348_s8 = smov [#allocation6]  }
   0x7   :  { %34 = dma.hbm_to_vmem [thread:$0]  %s27_s13, 7680, %s29_s15, [#allocation5], %s2346_s19, %s2346_s19, %s2347_s20  }
   0x8   :  { %s42_s21 = sshll.u32 %s2348_s8, 4  ;;  %s43_s21 = int_to_ptr.vmem [resolvable:$true] %s42_s21 }
   0x9   :  { %45 = dma.hbm_to_vmem [thread:$0]  %s41_s18, 480, %s43_s21, [#allocation7]  }
   0xa   :  { %2341 = dma.done.wait [#allocation5], 7680  }
   0xb   :  { %2342 = vsyncadd [#allocation5], 4294959616 }
   0xc   :  { %2343 = dma.done.wait [#allocation7], 480  }
   0xd   :  { %2344 = vsyncadd [#allocation7], 4294966816  ;;  %v72_v1 = vld [vmem:[%s3105_s1 + $0x38] sm:$0xff]  ;;  %v71_v2 = vld [vmem:[%s3105_s1 + $0x30] sm:$0xff]  ;;  %vm229_vm0 = vcmask 1046528   ;;  %vm73_vm1 = vcmask 523264  }
   0xe   :  { %85 = vmatpush.msra.mxu0 %v72_v1  ;;  %v70_v3 = vld [vmem:[%s3105_s1 + $0x28] sm:$0xff]  ;;  %v128_v5 = vld [vmem:[#allocation4 + $0xf8] sm:$0x7f]  ;;  %v129_v6 = vld [vmem:[#allocation4 + $0x100] sm:$0x7f]  ;;  %vm225_vm2 = vcmask 121856  }
   0xf   :  { %v127_v4 = vld [vmem:[#allocation4 + $0xf0] sm:$0x7f]  ;;  %v69_v7 = vld [vmem:[%s3105_s1 + $0x20] sm:$0xff]  ;;  %2120 = vmatpush.msk.msra.mxu2 %vm229_vm0, %v128_v5  ;;  %2122 = vmatpush.msk.msra.mxu3 %vm229_vm0, %v129_v6  ;;  %v68_v8 = vld [vmem:[%s3105_s1 + $0x18] sm:$0xff]  ;;  %vm972_vm3 = vcmask 1041408   ;;  %vm974_vm4 = vcmask 1045508  }
  0x10   :  { %86 = vmatpush.msra.mxu0 %v71_v2  ;;  %2118 = vmatpush.msk.msra.mxu1 %vm229_vm0, %v127_v4  ;;  %v67_v9 = vld [vmem:[%s3105_s1 + $0x10] sm:$0xff]  ;;  %v66_v10 = vld [vmem:[%s3105_s1 + $0x8] sm:$0xff]  ;;  %v65_v11 = vld [vmem:[%s3105_s1] sm:$0xff]  ;;  %vm976_vm5 = vcmask 1043456   ;;  %s2351_s8 = smov 64   ;;  %vm2085_vm9 = vcmask 130048  }
  0x11   :  { %v64_v12 = vld [vmem:[%s3104_s0] sm:$0x3]  ;;  %v136_v13 = vld [vmem:[#allocation4 + $0x138] sm:$0x7f]  ;;  %v98_v15 = vld [vmem:[#allocation4 + $0x8] sm:$0xff]  ;;  %vm2109_vm10 = vcmask 1024  }
  0x12   :  { %87 = vmatpush.msra.mxu0 %v70_v3  ;;  %v97_v14 = vld [vmem:[#allocation4] sm:$0xff]  ;;  %v99_v16 = vld [vmem:[#allocation4 + $0x10] sm:$0xff]  ;;  %355 = vmatpush.msra.mxu2 %v98_v15  ;;  %v106_v17 = vld [vmem:[#allocation4 + $0x48] sm:$0xff] }
  0x13   :  { %335 = vmatpush.msra.mxu1 %v97_v14  ;;  %375 = vmatpush.msra.mxu3 %v99_v16  ;;  %v131_v18 = vld [vmem:[#allocation4 + $0x110] sm:$0x7f]  ;;  %v101_v19 = vld [vmem:[#allocation4 + $0x20] sm:$0xff]  ;;  %v130_v20 = vld [vmem:[#allocation4 + $0x108] sm:$0x7f] }
  0x14   :  { %88 = vmatpush.msra.mxu0 %v69_v7  ;;  %2126 = vmatpush.msk.msrb.mxu2 %vm229_vm0, %v131_v18  ;;  %v132_v21 = vld [vmem:[#allocation4 + $0x118] sm:$0x7f]  ;;  %v102_v24 = vld [vmem:[#allocation4 + $0x28] sm:$0xff]  ;;  %v133_v28 = vld [vmem:[#allocation4 + $0x120] sm:$0x7f] }
  0x15   :  { %2124 = vmatpush.msk.msrb.mxu1 %vm229_vm0, %v130_v20  ;;  %v140_v22 = vld [vmem:[#allocation4 + $0x158] sm:$0x7f]  ;;  %2128 = vmatpush.msk.msrb.mxu3 %vm229_vm0, %v132_v21  ;;  %v110_v25 = vld [vmem:[#allocation4 + $0x68] sm:$0xff]  ;;  %v135_v29 = vld [vmem:[#allocation4 + $0x130] sm:$0x7f] }
  0x16   :  { %89 = vmatpush.msra.mxu0 %v68_v8  ;;  %v100_v23 = vld [vmem:[#allocation4 + $0x18] sm:$0xff]  ;;  %415 = vmatpush.msrb.mxu2 %v101_v19  ;;  %v134_v27 = vld [vmem:[#allocation4 + $0x128] sm:$0x7f]  ;;  %v103_v32 = vld [vmem:[#allocation4 + $0x30] sm:$0xff] }
  0x17   :  { %395 = vmatpush.msrb.mxu1 %v100_v23  ;;  %435 = vmatpush.msrb.mxu3 %v102_v24  ;;  %v144_v30 = vld [vmem:[#allocation4 + $0x178] sm:$0x7f]  ;;  %v105_v33 = vld [vmem:[#allocation4 + $0x40] sm:$0xff]  ;;  %v114_v34 = vld [vmem:[#allocation4 + $0x88] sm:$0xff]  ;;  %v2349_v23 = vmov 0.0  }
  0x18   :  { %90 = vmatpush.msra.mxu0 %v67_v9  ;;  %v104_v31 = vld [vmem:[#allocation4 + $0x38] sm:$0xff]  ;;  %v138_v35 = vld [vmem:[#allocation4 + $0x148] sm:$0x7f]  ;;  %v137_v36 = vld [vmem:[#allocation4 + $0x140] sm:$0x7f] }
  0x19   :  { %v139_v37 = vld [vmem:[#allocation4 + $0x150] sm:$0x7f]  ;;  %v148_v38 = vld [vmem:[#allocation4 + $0x198] sm:$0x7f]  ;;  %v109_v41 = vld [vmem:[#allocation4 + $0x60] sm:$0xff] }
  0x1a   :  { %91 = vmatpush.msra.mxu0 %v66_v10  ;;  %v108_v39 = vld [vmem:[#allocation4 + $0x58] sm:$0xff]  ;;  %v107_v40 = vld [vmem:[#allocation4 + $0x50] sm:$0xff]  ;;  %v118_v42 = vld [vmem:[#allocation4 + $0xa8] sm:$0xff] }
  0x1b   :  { %v142_v43 = vld [vmem:[#allocation4 + $0x168] sm:$0x7f]  ;;  %v141_v44 = vld [vmem:[#allocation4 + $0x160] sm:$0x7f]  ;;  %v143_v45 = vld [vmem:[#allocation4 + $0x170] sm:$0x7f] }
  0x1c   :  { %92 = vmatpush.msra.mxu0 %v65_v11  ;;  %v152_v46 = vld [vmem:[#allocation4 + $0x1b8] sm:$0x7f]  ;;  %v111_v48 = vld [vmem:[#allocation4 + $0x70] sm:$0xff]  ;;  %v113_v49 = vld [vmem:[#allocation4 + $0x80] sm:$0xff] }
  0x1d   :  { %2117 = vmatmul.msk.f32.vlgmr.msra.gmra.mxu0 %vm73_vm1, %v64_v12  ;;  %v112_v47 = vld [vmem:[#allocation4 + $0x78] sm:$0xff]  ;;  %v122_v50 = vld [vmem:[#allocation4 + $0xc8] sm:$0xff]  ;;  %v145_v52 = vld [vmem:[#allocation4 + $0x180] sm:$0x7f] }
  0x1e   :  { %2136 = vmatpush.msk.msrb.mxu0 %vm229_vm0, %v136_v13  ;;  %v146_v51 = vld [vmem:[#allocation4 + $0x188] sm:$0x7f]  ;;  %v147_v53 = vld [vmem:[#allocation4 + $0x190] sm:$0x7f]  ;;  %v156_v54 = vld [vmem:[#allocation4 + $0x1d8] sm:$0x7f] }
  0x1f   :  { %v116_v55 = vld [vmem:[#allocation4 + $0x98] sm:$0xff]  ;;  %v115_v56 = vld [vmem:[#allocation4 + $0x90] sm:$0xff]  ;;  %v117_v57 = vld [vmem:[#allocation4 + $0xa0] sm:$0xff] }
  0x20   :  { %515 = vmatpush.msrb.mxu0 %v106_v17  ;;  %v126_v58 = vld [vmem:[#allocation4 + $0xe8] sm:$0xff]  ;;  %v149_v60 = vld [vmem:[#allocation4 + $0x1a0] sm:$0x7f]  ;;  %v151_v61 = vld [vmem:[#allocation4 + $0x1b0] sm:$0x7f] }
  0x21   :  { %v150_v59 = vld [vmem:[#allocation4 + $0x1a8] sm:$0x7f]  ;;  %v120_v62 = vld [vmem:[#allocation4 + $0xb8] sm:$0xff]  ;;  %v119_v63 = vld [vmem:[#allocation4 + $0xb0] sm:$0xff] }
  0x22   :  { %2144 = vmatpush.msk.msra.mxu0 %vm229_vm0, %v140_v22  ;;  %v121_v0 = vld [vmem:[#allocation4 + $0xc0] sm:$0xff]  ;;  %v2517_v2 = vld [vmem:[%s3108_s4 + $0x68] sm:$0xff]  ;;  %v124_v7 = vld [vmem:[#allocation4 + $0xd8] sm:$0xff] }
  0x23   :  { %v2510_v1 = vld [vmem:[%s3108_s4 + $0x78] sm:$0xff]  ;;  %v154_v4 = vld [vmem:[#allocation4 + $0x1c8] sm:$0x7f]  ;;  %v155_v6 = vld [vmem:[#allocation4 + $0x1d0] sm:$0x7f] }
  0x24   :  { %595 = vmatpush.msra.mxu0 %v110_v25  ;;  %v2523_v3 = vld [vmem:[%s3108_s4 + $0x58] sm:$0xff]  ;;  %v123_v8 = vld [vmem:[#allocation4 + $0xd0] sm:$0xff]  ;;  %v2570_v14 = vld [vmem:[%s3108_s4 + $0x60] sm:$0xff] }
  0x25   :  { %v153_v5 = vld [vmem:[#allocation4 + $0x1c0] sm:$0x7f]  ;;  %v2539_v10 = vld [vmem:[%s3108_s4 + $0x48] sm:$0xff]  ;;  %v2557_v13 = vld [vmem:[%s3108_s4 + $0x70] sm:$0xff] }
  0x26   :  { %v125_v9 = vld [vmem:[#allocation4 + $0xe0] sm:$0xff]  ;;  %v2552_v12 = vld [vmem:[%s3108_s4 + $0x28] sm:$0xff]  ;;  %v2583_v16 = vld [vmem:[%s3108_s4 + $0x50] sm:$0xff] }
  0x27   :  { %v2546_v11 = vld [vmem:[%s3108_s4 + $0x38] sm:$0xff]  ;;  %v2590_v17 = vld [vmem:[%s3108_s4 + $0x8] sm:$0xff]  ;;  %v2601_v18 = vld [vmem:[%s3108_s4 + $0x40] sm:$0xff] }
  0x28   :  { %v2576_v15 = vld [vmem:[%s3108_s4 + $0x18] sm:$0xff]  ;;  %v2614_v19 = vld [vmem:[%s3108_s4 + $0x30] sm:$0xff]  ;;  %v2622_v20 = vld [vmem:[%s3108_s4 + $0x20] sm:$0xff] }
  0x29   :  { %v2631_v21 = vld [vmem:[%s3108_s4 + $0x10] sm:$0xff]  ;;  %v2640_v22 = vld [vmem:[%s3108_s4] sm:$0xff] }
  0x2a   :  { %v157_v25 = vld [vmem:[#allocation6] sm:$0xff] }
  0x9a   :  { %v2447_v26 = vpop.f32.mrf.mxu0 }
  0x9b   :  { %2119 = vmatmul.msk.f32.vlgmr.msra.gmra.mxu1 %vm225_vm2, %v2447_v26  ;;  %2121 = vmatmul.msk.f32.vlgmr.msra.gmra.mxu2 %vm225_vm2, %v2447_v26 }
  0x9c   :  { %2123 = vmatmul.msk.f32.vlgmr.msra.gmra.mxu3 %vm225_vm2, %v2447_v26  ;;  %2137 = vmatmul.msk.f32.vlgmr.msrb.gmra.mxu0 %vm225_vm2, %v2447_v26 }
  0x9d   :  { %2132 = vmatpush.msk.msra.mxu2 %vm229_vm0, %v134_v27  ;;  %2130 = vmatpush.msk.msra.mxu1 %vm229_vm0, %v133_v28  ;;  %v167_v27 = vperm.slane %v157_v25, 2  ;;  %v168_v28 = vperm.slane %v157_v25, 3 }
  0x9e   :  { %2134 = vmatpush.msk.msra.mxu3 %vm229_vm0, %v135_v29  ;;  %2152 = vmatpush.msk.msrb.mxu0 %vm229_vm0, %v144_v30  ;;  %v165_v30 = vperm.slane %v157_v25, 0 }
  0x9f   :  { %475 = vmatpush.msra.mxu2 %v104_v31  ;;  %455 = vmatpush.msra.mxu1 %v103_v32 }
  0xa0   :  { %495 = vmatpush.msra.mxu3 %v105_v33  ;;  %675 = vmatpush.msrb.mxu0 %v114_v34 }
  0xa3   :  { %2125 = vmatmul.msk.f32.vlgmr.msrb.gmra.mxu1 %vm225_vm2, %v2447_v26  ;;  %2127 = vmatmul.msk.f32.vlgmr.msrb.gmra.mxu2 %vm225_vm2, %v2447_v26 }
  0xa4   :  { %2129 = vmatmul.msk.f32.vlgmr.msrb.gmra.mxu3 %vm225_vm2, %v2447_v26  ;;  %2145 = vmatmul.msk.f32.vlgmr.msra.gmra.mxu0 %vm225_vm2, %v2447_v26 }
  0xa5   :  { %2140 = vmatpush.msk.msrb.mxu2 %vm229_vm0, %v138_v35  ;;  %2138 = vmatpush.msk.msrb.mxu1 %vm229_vm0, %v137_v36 }
  0xa6   :  { %2142 = vmatpush.msk.msrb.mxu3 %vm229_vm0, %v139_v37  ;;  %2160 = vmatpush.msk.msra.mxu0 %vm229_vm0, %v148_v38 }
  0xa7   :  { %555 = vmatpush.msrb.mxu2 %v108_v39  ;;  %535 = vmatpush.msrb.mxu1 %v107_v40 }
  0xa8   :  { %575 = vmatpush.msrb.mxu3 %v109_v41  ;;  %755 = vmatpush.msra.mxu0 %v118_v42 }
  0xab   :  { %2131 = vmatmul.msk.f32.vlgmr.msra.gmra.mxu1 %vm225_vm2, %v2447_v26  ;;  %2133 = vmatmul.msk.f32.vlgmr.msra.gmra.mxu2 %vm225_vm2, %v2447_v26 }
  0xac   :  { %2135 = vmatmul.msk.f32.vlgmr.msra.gmra.mxu3 %vm225_vm2, %v2447_v26  ;;  %2153 = vmatmul.msk.f32.vlgmr.msrb.gmra.mxu0 %vm225_vm2, %v2447_v26 }
  0xad   :  { %2148 = vmatpush.msk.msra.mxu2 %vm229_vm0, %v142_v43  ;;  %2146 = vmatpush.msk.msra.mxu1 %vm229_vm0, %v141_v44 }
  0xae   :  { %2150 = vmatpush.msk.msra.mxu3 %vm229_vm0, %v143_v45  ;;  %2168 = vmatpush.msk.msrb.mxu0 %vm229_vm0, %v152_v46  ;;  %v170_v45 = vperm.slane %v157_v25, 5 }
  0xaf   :  { %635 = vmatpush.msra.mxu2 %v112_v47  ;;  %615 = vmatpush.msra.mxu1 %v111_v48 }
  0xb0   :  { %655 = vmatpush.msra.mxu3 %v113_v49  ;;  %835 = vmatpush.msrb.mxu0 %v122_v50  ;;  %v171_v49 = vperm.slane %v157_v25, 6 }
  0xb3   :  { %2139 = vmatmul.msk.f32.vlgmr.msrb.gmra.mxu1 %vm225_vm2, %v2447_v26  ;;  %2141 = vmatmul.msk.f32.vlgmr.msrb.gmra.mxu2 %vm225_vm2, %v2447_v26 }
  0xb4   :  { %2143 = vmatmul.msk.f32.vlgmr.msrb.gmra.mxu3 %vm225_vm2, %v2447_v26  ;;  %2161 = vmatmul.msk.f32.vlgmr.msra.gmra.mxu0 %vm225_vm2, %v2447_v26 }
  0xb5   :  { %2156 = vmatpush.msk.msrb.mxu2 %vm229_vm0, %v146_v51  ;;  %2154 = vmatpush.msk.msrb.mxu1 %vm229_vm0, %v145_v52  ;;  %v172_v51 = vperm.slane %v157_v25, 7  ;;  %v158_v52 = vld [vmem:[#allocation6 + $0x8] sm:$0xff] }
  0xb6   :  { %2158 = vmatpush.msk.msrb.mxu3 %vm229_vm0, %v147_v53  ;;  %2176 = vmatpush.msk.msra.mxu0 %vm229_vm0, %v156_v54  ;;  %v169_v53 = vperm.slane %v157_v25, 4 }
  0xb7   :  { %715 = vmatpush.msrb.mxu2 %v116_v55  ;;  %695 = vmatpush.msrb.mxu1 %v115_v56 }
  0xb8   :  { %735 = vmatpush.msrb.mxu3 %v117_v57  ;;  %915 = vmatpush.msra.mxu0 %v126_v58 }
  0xbb   :  { %2147 = vmatmul.msk.f32.vlgmr.msra.gmra.mxu1 %vm225_vm2, %v2447_v26  ;;  %2149 = vmatmul.msk.f32.vlgmr.msra.gmra.mxu2 %vm225_vm2, %v2447_v26 }
  0xbc   :  { %2151 = vmatmul.msk.f32.vlgmr.msra.gmra.mxu3 %vm225_vm2, %v2447_v26  ;;  %2169 = vmatmul.msk.f32.vlgmr.msrb.gmra.mxu0 %vm225_vm2, %v2447_v26 }
  0xbd   :  { %2164 = vmatpush.msk.msra.mxu2 %vm229_vm0, %v150_v59  ;;  %2162 = vmatpush.msk.msra.mxu1 %vm229_vm0, %v149_v60  ;;  %v174_v59 = vperm.slane %v158_v52, 1 }
  0xbe   :  { %2166 = vmatpush.msk.msra.mxu3 %vm229_vm0, %v151_v61  ;;  %1146 = vmatpush.msrb.mxu0 %v2510_v1 }
  0xbf   :  { %795 = vmatpush.msra.mxu2 %v120_v62  ;;  %775 = vmatpush.msra.mxu1 %v119_v63 }
  0xc0   :  { %815 = vmatpush.msra.mxu3 %v121_v0  ;;  %1147 = vmatpush.msrb.mxu0 %v2517_v2  ;;  %v175_v0 = vperm.slane %v158_v52, 2 }
  0xc2   :  { %1148 = vmatpush.msrb.mxu0 %v2523_v3 }
  0xc3   :  { %2155 = vmatmul.msk.f32.vlgmr.msrb.gmra.mxu1 %vm225_vm2, %v2447_v26  ;;  %2157 = vmatmul.msk.f32.vlgmr.msrb.gmra.mxu2 %vm225_vm2, %v2447_v26 }
  0xc4   :  { %2159 = vmatmul.msk.f32.vlgmr.msrb.gmra.mxu3 %vm225_vm2, %v2447_v26  ;;  %2177 = vmatmul.msk.f32.vlgmr.msra.gmra.mxu0 %vm225_vm2, %v2447_v26 }
  0xc5   :  { %2172 = vmatpush.msk.msrb.mxu2 %vm229_vm0, %v154_v4  ;;  %2170 = vmatpush.msk.msrb.mxu1 %vm229_vm0, %v153_v5 }
  0xc6   :  { %2174 = vmatpush.msk.msrb.mxu3 %vm229_vm0, %v155_v6  ;;  %1149 = vmatpush.msrb.mxu0 %v2539_v10 }
  0xc7   :  { %875 = vmatpush.msrb.mxu2 %v124_v7  ;;  %855 = vmatpush.msrb.mxu1 %v123_v8  ;;  %v173_v7 = vperm.slane %v158_v52, 0  ;;  %v176_v8 = vperm.slane %v158_v52, 3 }
  0xc8   :  { %895 = vmatpush.msrb.mxu3 %v125_v9  ;;  %1150 = vmatpush.msrb.mxu0 %v2546_v11 }
  0xca   :  { %1151 = vmatpush.msrb.mxu0 %v2552_v12 }
  0xcb   :  { %2163 = vmatmul.msk.f32.vlgmr.msra.gmra.mxu1 %vm225_vm2, %v2447_v26  ;;  %2165 = vmatmul.msk.f32.vlgmr.msra.gmra.mxu2 %vm225_vm2, %v2447_v26 }
  0xcc   :  { %2167 = vmatmul.msk.f32.vlgmr.msra.gmra.mxu3 %vm225_vm2, %v2447_v26  ;;  %1070 = vmatpush.msra.mxu2 %v2510_v1 }
  0xcd   :  { %1050 = vmatpush.msra.mxu1 %v2557_v13  ;;  %1126 = vmatpush.msra.mxu3 %v2557_v13 }
  0xce   :  { %1071 = vmatpush.msra.mxu2 %v2517_v2  ;;  %1152 = vmatpush.msrb.mxu0 %v2576_v15 }
  0xcf   :  { %1051 = vmatpush.msra.mxu1 %v2570_v14  ;;  %1127 = vmatpush.msra.mxu3 %v2570_v14 }
  0xd0   :  { %1072 = vmatpush.msra.mxu2 %v2523_v3  ;;  %1153 = vmatpush.msrb.mxu0 %v2590_v17 }
  0xd1   :  { %1052 = vmatpush.msra.mxu1 %v2583_v16  ;;  %1128 = vmatpush.msra.mxu3 %v2583_v16 }
  0xd2   :  { %1073 = vmatpush.msra.mxu2 %v2539_v10  ;;  %1278 = vmatpush.msra.mxu0 %v2510_v1 }
  0xd3   :  { %2171 = vmatmul.msk.f32.vlgmr.msrb.gmra.mxu1 %vm225_vm2, %v2447_v26  ;;  %2173 = vmatmul.msk.f32.vlgmr.msrb.gmra.mxu2 %vm225_vm2, %v2447_v26 }
  0xd4   :  { %2175 = vmatmul.msk.f32.vlgmr.msrb.gmra.mxu3 %vm225_vm2, %v2447_v26  ;;  %1074 = vmatpush.msra.mxu2 %v2546_v11  ;;  %v166_v26 = vperm.slane %v157_v25, 1 }
  0xd5   :  { %1053 = vmatpush.msra.mxu1 %v2601_v18  ;;  %1129 = vmatpush.msra.mxu3 %v2601_v18 }
  0xd6   :  { %1075 = vmatpush.msra.mxu2 %v2552_v12  ;;  %1279 = vmatpush.msra.mxu0 %v2517_v2 }
  0xd7   :  { %1054 = vmatpush.msra.mxu1 %v2614_v19  ;;  %1130 = vmatpush.msra.mxu3 %v2614_v19 }
  0xd8   :  { %1076 = vmatpush.msra.mxu2 %v2576_v15  ;;  %1280 = vmatpush.msra.mxu0 %v2523_v3 }
  0xd9   :  { %1055 = vmatpush.msra.mxu1 %v2622_v20  ;;  %1131 = vmatpush.msra.mxu3 %v2622_v20 }
  0xda   :  { %1077 = vmatpush.msra.mxu2 %v2590_v17  ;;  %1281 = vmatpush.msra.mxu0 %v2539_v10 }
  0xdb   :  { %1078 = vmatmul.f32.vlgmr.msra.gmra.mxu2 %v2349_v23  ;;  %1056 = vmatpush.msra.mxu1 %v2631_v21 }
  0xdc   :  { %1132 = vmatpush.msra.mxu3 %v2631_v21  ;;  %1212 = vmatpush.msrb.mxu2 %v2510_v1 }
  0xdd   :  { %1057 = vmatpush.msra.mxu1 %v2640_v22  ;;  %1282 = vmatpush.msra.mxu0 %v2546_v11 }
  0xde   :  { %1058 = vmatmul.f32.vlgmr.msra.gmra.mxu1 %v2349_v23  ;;  %1133 = vmatpush.msra.mxu3 %v2640_v22 }
  0xdf   :  { %1192 = vmatpush.msrb.mxu1 %v2557_v13  ;;  %1213 = vmatpush.msrb.mxu2 %v2517_v2 }
  0xe0   :  { %1258 = vmatpush.msrb.mxu3 %v2557_v13  ;;  %1283 = vmatpush.msra.mxu0 %v2552_v12 }
  0xe1   :  { %1193 = vmatpush.msrb.mxu1 %v2570_v14  ;;  %1214 = vmatpush.msrb.mxu2 %v2523_v3 }
  0xe2   :  { %1259 = vmatpush.msrb.mxu3 %v2570_v14  ;;  %1284 = vmatpush.msra.mxu0 %v2576_v15 }
  0xe3   :  { %1194 = vmatpush.msrb.mxu1 %v2583_v16  ;;  %1215 = vmatpush.msrb.mxu2 %v2539_v10 }
  0xe4   :  { %1260 = vmatpush.msrb.mxu3 %v2583_v16  ;;  %1285 = vmatpush.msra.mxu0 %v2590_v17 }
  0xe5   :  { %1195 = vmatpush.msrb.mxu1 %v2601_v18  ;;  %1216 = vmatpush.msrb.mxu2 %v2546_v11 }
  0xe6   :  { %1261 = vmatpush.msrb.mxu3 %v2601_v18 }
  0xe7   :  { %1196 = vmatpush.msrb.mxu1 %v2614_v19  ;;  %1217 = vmatpush.msrb.mxu2 %v2552_v12 }
  0xe8   :  { %1262 = vmatpush.msrb.mxu3 %v2614_v19 }
  0xe9   :  { %1197 = vmatpush.msrb.mxu1 %v2622_v20  ;;  %1218 = vmatpush.msrb.mxu2 %v2576_v15 }
  0xea   :  { %1263 = vmatpush.msrb.mxu3 %v2622_v20 }
  0xeb   :  { %1198 = vmatpush.msrb.mxu1 %v2631_v21  ;;  %1219 = vmatpush.msrb.mxu2 %v2590_v17 }
  0xec   :  { %1264 = vmatpush.msrb.mxu3 %v2631_v21 }
  0xed   :  { %1344 = vmatpush.msra.mxu2 %v2510_v1  ;;  %1199 = vmatpush.msrb.mxu1 %v2640_v22 }
  0xee   :  { %1265 = vmatpush.msrb.mxu3 %v2640_v22 }
  0xef   :  { %1324 = vmatpush.msra.mxu1 %v2557_v13  ;;  %1345 = vmatpush.msra.mxu2 %v2517_v2 }
  0xf1   :  { %1325 = vmatpush.msra.mxu1 %v2570_v14  ;;  %1346 = vmatpush.msra.mxu2 %v2523_v3 }
  0xf3   :  { %1326 = vmatpush.msra.mxu1 %v2583_v16  ;;  %1347 = vmatpush.msra.mxu2 %v2539_v10 }
  0xf5   :  { %1327 = vmatpush.msra.mxu1 %v2601_v18  ;;  %1348 = vmatpush.msra.mxu2 %v2546_v11 }
  0xf7   :  { %1328 = vmatpush.msra.mxu1 %v2614_v19  ;;  %1349 = vmatpush.msra.mxu2 %v2552_v12 }
  0xf9   :  { %1329 = vmatpush.msra.mxu1 %v2622_v20  ;;  %1350 = vmatpush.msra.mxu2 %v2576_v15 }
  0xfb   :  { %1330 = vmatpush.msra.mxu1 %v2631_v21  ;;  %1351 = vmatpush.msra.mxu2 %v2590_v17 }
  0xfd   :  { %1331 = vmatpush.msra.mxu1 %v2640_v22 }
 0x118   :  { %v337_v24 = vpop.f32.mrf.mxu1 }
 0x119   :  { %v517_v31 = vpop.f32.mrf.mxu0  ;;  %v338_v38 = vadd.f32 %v337_v24, %v165_v30  ;;  %v178_v30 = vperm.slane %v158_v52, 5 }
 0x11a   :  { %v518_v24 = vadd.f32 %v517_v31, %v174_v59 }
 0x11e   :  { %v357_v29 = vpop.f32.mrf.mxu2 }
 0x11f   :  { %v358_v32 = vadd.f32 %v357_v29, %v166_v26  ;;  %v377_v33 = vpop.f32.mrf.mxu3 }
 0x120   :  { %v378_v34 = vadd.f32 %v377_v33, %v167_v27  ;;  %v397_v35 = vpop.f32.mrf.mxu1  ;;  %v956_v33 = vrot.slane %v518_v24, 6 }
 0x121   :  { %v950_v36 = vrot.slane %v358_v32, 6  ;;  %v398_v37 = vadd.f32 %v397_v35, %v168_v28  ;;  %v597_v48 = vpop.f32.mrf.mxu0 }
 0x122   :  { %v951_v39 = vrot.slane %v378_v34, 4 }
 0x123   :  { %v952_v40 = vrot.slane %v398_v37, 2  ;;  %v973_v41 = vsel %vm972_vm3, %v338_v38, %v950_v36  ;;  %v179_v36 = vperm.slane %v158_v52, 6 }
 0x125   :  { %v975_v42 = vsel %vm974_vm4, %v951_v39, %v952_v40  ;;  %v177_v39 = vperm.slane %v158_v52, 4  ;;  %v180_v40 = vperm.slane %v158_v52, 7 }
 0x126   :  { %v977_v43 = vsel %vm976_vm5, %v973_v41, %v975_v42  ;;  %v417_v44 = vpop.f32.mrf.mxu2  ;;  %v598_v41 = vadd.f32 %v597_v48, %v178_v30  ;;  %v159_v42 = vld [vmem:[#allocation6 + $0x10] sm:$0xff] }
 0x127   :  { %1005 = vst [vmem:[#allocation2] sm:$0xff] %v977_v43  ;;  %v437_v46 = vpop.f32.mrf.mxu3  ;;  %v418_v61 = vadd.f32 %v417_v44, %v169_v53  ;;  %v184_v48 = vperm.slane %v159_v42, 3  ;;  %v185_v30 = vperm.slane %v159_v42, 4 }
 0x128   :  { %v457_v47 = vpop.f32.mrf.mxu1  ;;  %v438_v50 = vadd.f32 %v437_v46, %v170_v45  ;;  %v959_v53 = vrot.slane %v598_v41, 6 }
 0x129   :  { %v458_v54 = vadd.f32 %v457_v47, %v171_v49  ;;  %v677_v5 = vpop.f32.mrf.mxu0 }
 0x12a   :  { %v953_v56 = vrot.slane %v438_v50, 6  ;;  %v182_v50 = vperm.slane %v159_v42, 1 }
 0x12b   :  { %v954_v62 = vrot.slane %v458_v54, 4 }
 0x12c   :  { %v978_v4 = vsel %vm972_vm3, %v418_v61, %v953_v56  ;;  %v183_v56 = vperm.slane %v159_v42, 2 }
 0x12e   :  { %v477_v55 = vpop.f32.mrf.mxu2 }
 0x12f   :  { %v478_v57 = vadd.f32 %v477_v55, %v172_v51  ;;  %v497_v58 = vpop.f32.mrf.mxu3 }
 0x130   :  { %v537_v60 = vpop.f32.mrf.mxu1  ;;  %v498_v27 = vadd.f32 %v497_v58, %v173_v7  ;;  %v181_v58 = vperm.slane %v159_v42, 0  ;;  %v186_v7 = vperm.slane %v159_v42, 5 }
 0x131   :  { %v955_v63 = vrot.slane %v478_v57, 2  ;;  %v538_v25 = vadd.f32 %v537_v60, %v175_v0  ;;  %v757_v43 = vpop.f32.mrf.mxu0  ;;  %v678_v60 = vadd.f32 %v677_v5, %v182_v50  ;;  %v188_v5 = vperm.slane %v159_v42, 7 }
 0x132   :  { %v981_v37 = vsel %vm972_vm3, %v498_v27, %v956_v33  ;;  %v1029_v27 = vlaneseq  ;;  %v758_v33 = vadd.f32 %v757_v43, %v186_v7 }
 0x133   :  { %v979_v6 = vsel %vm974_vm4, %v954_v62, %v955_v63  ;;  %v957_v34 = vrot.slane %v538_v25, 4 }
 0x134   :  { %v980_v9 = vsel %vm976_vm5, %v978_v4, %v979_v6 }
 0x135   :  { %1006 = vst [vmem:[#allocation2 + $0x8] sm:$0xff] %v980_v9  ;;  %v962_v9 = vrot.slane %v678_v60, 6 }
 0x136   :  { %v557_v26 = vpop.f32.mrf.mxu2 }
 0x137   :  { %v558_v28 = vadd.f32 %v557_v26, %v176_v8  ;;  %v577_v29 = vpop.f32.mrf.mxu3  ;;  %v187_v26 = vperm.slane %v159_v42, 6 }
 0x138   :  { %v617_v32 = vpop.f32.mrf.mxu1  ;;  %v578_v46 = vadd.f32 %v577_v29, %v177_v39 }
 0x139   :  { %v958_v35 = vrot.slane %v558_v28, 2  ;;  %v618_v44 = vadd.f32 %v617_v32, %v179_v36  ;;  %v837_v63 = vpop.f32.mrf.mxu0  ;;  %v1030_v36 = vand.u32 127, %v1029_v27 }
 0x13a   :  { %v984_v57 = vsel %vm972_vm3, %v578_v46, %v959_v53 }
 0x13b   :  { %v982_v38 = vsel %vm974_vm4, %v957_v34, %v958_v35  ;;  %v960_v54 = vrot.slane %v618_v44, 4  ;;  %v160_v34 = vld [vmem:[#allocation6 + $0x18] sm:$0x3f]  ;;  %v965_v44 = vrot.slane %v758_v33, 6  ;;  %v1031_v50 = vadd.s32 128, %v1030_v36 }
 0x13c   :  { %v983_v31 = vsel %vm976_vm5, %v981_v37, %v982_v38  ;;  %v194_v41 = vperm.slane %v160_v34, 5  ;;  %v189_v53 = vperm.slane %v160_v34, 0 }
 0x13d   :  { %1007 = vst [vmem:[#allocation2 + $0x10] sm:$0xff] %v983_v31  ;;  %v190_v31 = vperm.slane %v160_v34, 1  ;;  %vm1033_vm6 = vcmp.lt.s32.totalorder %v1031_v50, 192 }
 0x13e   :  { %v637_v45 = vpop.f32.mrf.mxu2  ;;  %v1037_v36 = vsel %vm1033_vm6, 0.5, %v2349_v23 }
 0x13f   :  { %v638_v47 = vadd.f32 %v637_v45, %v180_v40  ;;  %v657_v49 = vpop.f32.mrf.mxu3 }
 0x140   :  { %v697_v51 = vpop.f32.mrf.mxu1  ;;  %v658_v0 = vadd.f32 %v657_v49, %v181_v58  ;;  %v191_v49 = vperm.slane %v160_v34, 2 }
 0x141   :  { %v961_v55 = vrot.slane %v638_v47, 2  ;;  %v698_v61 = vadd.f32 %v697_v51, %v183_v56  ;;  %v917_v45 = vpop.f32.mrf.mxu0 }
 0x142   :  { %v987_v28 = vsel %vm972_vm3, %v658_v0, %v962_v9 }
 0x143   :  { %v985_v52 = vsel %vm974_vm4, %v960_v54, %v961_v55  ;;  %v963_v24 = vrot.slane %v698_v61, 4  ;;  %v192_v54 = vperm.slane %v160_v34, 3  ;;  %v918_v55 = vadd.f32 %v917_v45, %v194_v41 }
 0x144   :  { %v986_v59 = vsel %vm976_vm5, %v984_v57, %v985_v52  ;;  %v193_v57 = vperm.slane %v160_v34, 4  ;;  %v838_v52 = vadd.f32 %v837_v63, %v190_v31 }
 0x145   :  { %1008 = vst [vmem:[#allocation2 + $0x18] sm:$0xff] %v986_v59 }
 0x146   :  { %v717_v62 = vpop.f32.mrf.mxu2 }
 0x147   :  { %v718_v4 = vadd.f32 %v717_v62, %v184_v48  ;;  %v737_v6 = vpop.f32.mrf.mxu3  ;;  %v971_v62 = vrot.slane %v918_v55, 6 }
 0x148   :  { %v777_v8 = vpop.f32.mrf.mxu1  ;;  %v738_v38 = vadd.f32 %v737_v6, %v185_v30 }
 0x149   :  { %v964_v25 = vrot.slane %v718_v4, 2  ;;  %v778_v35 = vadd.f32 %v777_v8, %v187_v26  ;;  %v968_v4 = vrot.slane %v838_v52, 6  ;;  %v2350_v8 = vmov 1.0  }
 0x14a   :  { %v990_v51 = vsel %vm972_vm3, %v738_v38, %v965_v44  ;;  %v1035_v9 = vsel %vm1033_vm6, 0.5, %v2350_v8  ;;  %v1180_v8 = vld [vmem:[#allocation2 + $0x8] sm:$0xf] }
 0x14b   :  { %v988_v29 = vsel %vm974_vm4, %v963_v24, %v964_v25  ;;  %v966_v46 = vrot.slane %v778_v35, 4  ;;  %v1090_v27 = vrot.slane %v1035_v9, 6 }
 0x14c   :  { %v989_v32 = vsel %vm976_vm5, %v987_v28, %v988_v29 }
 0x14d   :  { %1009 = vst [vmem:[#allocation2 + $0x20] sm:$0xff] %v989_v32  ;;  %v1038_v32 = vld [vmem:[#allocation2] sm:$0xf] }
 0x14e   :  { %v797_v37 = vpop.f32.mrf.mxu2 }
 0x14f   :  { %v798_v39 = vadd.f32 %v797_v37, %v188_v5  ;;  %v817_v40 = vpop.f32.mrf.mxu3  ;;  %v2717_v5 = vsel %vm972_vm3, 0.5, %v1090_v27  ;;  %v1098_v37 = vrot.slane %v1037_v36, 6 }
 0x150   :  { %v857_v42 = vpop.f32.mrf.mxu1  ;;  %v818_v59 = vadd.f32 %v817_v40, %v189_v53 }
 0x151   :  { %v967_v47 = vrot.slane %v798_v39, 2  ;;  %v858_v58 = vadd.f32 %v857_v42, %v191_v49  ;;  %v2724_v39 = vsel %vm972_vm3, 0.5, %v1098_v37 }
 0x152   :  { %v993_v25 = vsel %vm972_vm3, %v818_v59, %v968_v4 }
 0x153   :  { %v991_v43 = vsel %vm974_vm4, %v966_v46, %v967_v47  ;;  %v969_v6 = vrot.slane %v858_v58, 4 }
 0x154   :  { %v992_v56 = vsel %vm976_vm5, %v990_v51, %v991_v43  ;;  %v1114_v43 = vld [vmem:[#allocation2 + $0x4] sm:$0xf] }
 0x155   :  { %1010 = vst [vmem:[#allocation2 + $0x28] sm:$0xff] %v992_v56 }
 0x156   :  { %v877_v48 = vpop.f32.mrf.mxu2 }
 0x157   :  { %v878_v60 = vadd.f32 %v877_v48, %v192_v54  ;;  %v897_v61 = vpop.f32.mrf.mxu3 }
 0x158   :  { %v898_v0 = vadd.f32 %v897_v61, %v193_v57 }
 0x159   :  { %v970_v7 = vrot.slane %v878_v60, 2 }
 0x15a   :  { %v996_v24 = vsel %vm972_vm3, %v898_v0, %v971_v62 }
 0x15b   :  { %v994_v63 = vsel %vm974_vm4, %v969_v6, %v970_v7  ;;  %1012 = vst [vmem:[#allocation2 + $0x38] sm:$0xf] %v996_v24  ;;  %v1059_v29 = vpop.f32.mrf.mxu1 }
 0x15c   :  { %v995_v26 = vsel %vm976_vm5, %v993_v25, %v994_v63 }
 0x15d   :  { %1011 = vst [vmem:[#allocation2 + $0x30] sm:$0xff] %v995_v26 }
 0x15e   :  { %v1079_v28 = vpop.f32.mrf.mxu2 }
 0x15f   :  { %v1084_v30 = vrot.slane %v1079_v28, 6 }
 0x161   :  { %v1085_v33 = vsel %vm972_vm3, %v1059_v29, %v1084_v30 }
 0x162   :  { %v1087_v34 = vadd.f32 %v1085_v33, %v1038_v32 }
 0x164   :  { %v1093_v35 = vmul.f32 %v2717_v5, %v1087_v34 }
 0x166   :  { %2217 = vtanh.f32 %v1093_v35 }
 0x16c   :  { %v2218_v38 = vpop.eup %2217 }
 0x16d   :  { %v1095_v40 = vmul.f32 %v2218_v38, %v2717_v5 }
 0x16f   :  { %v1101_v31 = vadd.f32 %v2724_v39, %v1095_v40  ;;  %v1246_v40 = vld [vmem:[#allocation2 + $0xc] sm:$0xf] }
 0x171   :  { %v1104_v41 = vrot.slane %v1101_v31, 2  ;;  %v1102_v45 = vmul.f32 0.0, %v1101_v31 }
 0x173   :  { %v1106_v44 = vmul.f32 %v1104_v41, %v1101_v31 }
 0x175   :  { %1108 = vrot.lane.b32.xlu0 %v1106_v44, %s2351_s8 }
 0x1e7   :  { %v1109_v46 = vpop.permute.xlu0 %1108 }
 0x1e8   :  { %v1111_v47 = vadd.f32 %v1109_v46, %v1102_v45 }
 0x1ea   :  { %2219 = vtanh.f32 %v1111_v47 }
 0x1f0   :  { %v2220_v23 = vpop.eup %2219 }
 0x1f1   :  { %v1113_v49 = vmul.f32 %v2220_v23, %v1104_v41 }
 0x1f3   :  { %2178 = vmatmul.msk.f32.vlgmr.msra.gmra.mxu3 %vm73_vm1, %v1113_v49  ;;  %2179 = vmatmul.msk.f32.vlgmr.msrb.gmra.mxu0 %vm73_vm1, %v1113_v49 }
 0x1f4   :  { %1390 = vmatpush.msra.mxu3 %v2557_v13  ;;  %1410 = vmatpush.msrb.mxu0 %v2510_v1 }
 0x1f6   :  { %1391 = vmatpush.msra.mxu3 %v2570_v14  ;;  %1411 = vmatpush.msrb.mxu0 %v2517_v2 }
 0x1f8   :  { %1392 = vmatpush.msra.mxu3 %v2583_v16  ;;  %1412 = vmatpush.msrb.mxu0 %v2523_v3 }
 0x1fa   :  { %1393 = vmatpush.msra.mxu3 %v2601_v18  ;;  %1413 = vmatpush.msrb.mxu0 %v2539_v10 }
 0x1fc   :  { %1394 = vmatpush.msra.mxu3 %v2614_v19  ;;  %1414 = vmatpush.msrb.mxu0 %v2546_v11 }
 0x1fe   :  { %1395 = vmatpush.msra.mxu3 %v2622_v20  ;;  %1415 = vmatpush.msrb.mxu0 %v2552_v12 }
 0x200   :  { %1396 = vmatpush.msra.mxu3 %v2631_v21  ;;  %1416 = vmatpush.msrb.mxu0 %v2576_v15 }
 0x202   :  { %1397 = vmatpush.msra.mxu3 %v2640_v22  ;;  %1417 = vmatpush.msrb.mxu0 %v2590_v17 }
 0x270   :  { %v1155_v50 = vpop.f32.mrf.mxu0 }
 0x271   :  { %v1160_v42 = vrot.slane %v1155_v50, 6 }
 0x276   :  { %v1135_v51 = vpop.f32.mrf.mxu3 }
 0x277   :  { %v1161_v53 = vsel %vm972_vm3, %v1135_v51, %v1160_v42 }
 0x278   :  { %v1163_v54 = vadd.f32 %v1161_v53, %v1114_v43 }
 0x27a   :  { %v1164_v55 = vmul.f32 %v1163_v54, %v2717_v5 }
 0x27c   :  { %2221 = vtanh.f32 %v1164_v55 }
 0x282   :  { %v2222_v56 = vpop.eup %2221 }
 0x283   :  { %v1166_v57 = vmul.f32 %v2222_v56, %v2717_v5 }
 0x285   :  { %v1167_v52 = vadd.f32 %v1166_v57, %v2724_v39  ;;  %v1312_v57 = vld [vmem:[#allocation2 + $0x10] sm:$0xf] }
 0x287   :  { %v1170_v58 = vrot.slane %v1167_v52, 2  ;;  %v1168_v59 = vmul.f32 %v1167_v52, %v1111_v47 }
 0x289   :  { %v1172_v48 = vmul.f32 %v1170_v58, %v1167_v52 }
 0x28b   :  { %1174 = vrot.lane.b32.xlu0 %v1172_v48, %s2351_s8 }
 0x2fd   :  { %v1175_v60 = vpop.permute.xlu0 %1174 }
 0x2fe   :  { %v1177_v61 = vadd.f32 %v1175_v60, %v1168_v59 }
 0x300   :  { %2223 = vtanh.f32 %v1177_v61 }
 0x306   :  { %v2224_v62 = vpop.eup %2223 }
 0x307   :  { %v1179_v0 = vmul.f32 %v2224_v62, %v1170_v58 }
 0x309   :  { %2180 = vmatmul.msk.f32.vlgmr.msrb.gmra.mxu1 %vm73_vm1, %v1179_v0  ;;  %2181 = vmatmul.msk.f32.vlgmr.msrb.gmra.mxu2 %vm73_vm1, %v1179_v0 }
 0x30a   :  { %1456 = vmatpush.msrb.mxu1 %v2557_v13  ;;  %1476 = vmatpush.msrb.mxu2 %v2510_v1 }
 0x30c   :  { %1457 = vmatpush.msrb.mxu1 %v2570_v14  ;;  %1477 = vmatpush.msrb.mxu2 %v2517_v2 }
 0x30e   :  { %1458 = vmatpush.msrb.mxu1 %v2583_v16  ;;  %1478 = vmatpush.msrb.mxu2 %v2523_v3 }
 0x310   :  { %1459 = vmatpush.msrb.mxu1 %v2601_v18  ;;  %1479 = vmatpush.msrb.mxu2 %v2539_v10 }
 0x312   :  { %1460 = vmatpush.msrb.mxu1 %v2614_v19  ;;  %1480 = vmatpush.msrb.mxu2 %v2546_v11 }
 0x314   :  { %1461 = vmatpush.msrb.mxu1 %v2622_v20  ;;  %1481 = vmatpush.msrb.mxu2 %v2552_v12 }
 0x316   :  { %1462 = vmatpush.msrb.mxu1 %v2631_v21  ;;  %1482 = vmatpush.msrb.mxu2 %v2576_v15 }
 0x318   :  { %1463 = vmatpush.msrb.mxu1 %v2640_v22  ;;  %1483 = vmatpush.msrb.mxu2 %v2590_v17 }
 0x386   :  { %v1201_v7 = vpop.f32.mrf.mxu1 }
 0x38c   :  { %v1221_v4 = vpop.f32.mrf.mxu2 }
 0x38d   :  { %v1226_v6 = vrot.slane %v1221_v4, 6 }
 0x38f   :  { %v1227_v9 = vsel %vm972_vm3, %v1201_v7, %v1226_v6 }
 0x390   :  { %v1229_v24 = vadd.f32 %v1227_v9, %v1180_v8 }
 0x392   :  { %v1230_v25 = vmul.f32 %v1229_v24, %v2717_v5 }
 0x394   :  { %2225 = vtanh.f32 %v1230_v25 }
 0x39a   :  { %v2226_v63 = vpop.eup %2225 }
 0x39b   :  { %v1232_v26 = vmul.f32 %v2226_v63, %v2717_v5 }
 0x39d   :  { %v1233_v27 = vadd.f32 %v1232_v26, %v2724_v39  ;;  %v1378_v26 = vld [vmem:[#allocation2 + $0x14] sm:$0xf] }
 0x39f   :  { %v1236_v28 = vrot.slane %v1233_v27, 2  ;;  %v1234_v30 = vmul.f32 %v1233_v27, %v1177_v61 }
 0x3a1   :  { %v1238_v29 = vmul.f32 %v1236_v28, %v1233_v27 }
 0x3a3   :  { %1240 = vrot.lane.b32.xlu1 %v1238_v29, %s2351_s8 }
 0x415   :  { %v1241_v32 = vpop.permute.xlu1 %1240 }
 0x416   :  { %v1243_v33 = vadd.f32 %v1241_v32, %v1234_v30 }
 0x418   :  { %2227 = vtanh.f32 %v1243_v33 }
 0x41e   :  { %v2228_v34 = vpop.eup %2227 }
 0x41f   :  { %v1245_v35 = vmul.f32 %v2228_v34, %v1236_v28 }
 0x421   :  { %2182 = vmatmul.msk.f32.vlgmr.msrb.gmra.mxu3 %vm73_vm1, %v1245_v35  ;;  %2183 = vmatmul.msk.f32.vlgmr.msra.gmra.mxu0 %vm73_vm1, %v1245_v35 }
 0x422   :  { %1522 = vmatpush.msrb.mxu3 %v2557_v13  ;;  %1542 = vmatpush.msra.mxu0 %v2510_v1 }
 0x424   :  { %1523 = vmatpush.msrb.mxu3 %v2570_v14  ;;  %1543 = vmatpush.msra.mxu0 %v2517_v2 }
 0x426   :  { %1524 = vmatpush.msrb.mxu3 %v2583_v16  ;;  %1544 = vmatpush.msra.mxu0 %v2523_v3 }
 0x428   :  { %1525 = vmatpush.msrb.mxu3 %v2601_v18  ;;  %1545 = vmatpush.msra.mxu0 %v2539_v10 }
 0x42a   :  { %1526 = vmatpush.msrb.mxu3 %v2614_v19  ;;  %1546 = vmatpush.msra.mxu0 %v2546_v11 }
 0x42c   :  { %1527 = vmatpush.msrb.mxu3 %v2622_v20  ;;  %1547 = vmatpush.msra.mxu0 %v2552_v12 }
 0x42e   :  { %1528 = vmatpush.msrb.mxu3 %v2631_v21  ;;  %1548 = vmatpush.msra.mxu0 %v2576_v15 }
 0x430   :  { %1529 = vmatpush.msrb.mxu3 %v2640_v22  ;;  %1549 = vmatpush.msra.mxu0 %v2590_v17 }
 0x49e   :  { %v1287_v36 = vpop.f32.mrf.mxu0 }
 0x49f   :  { %v1292_v37 = vrot.slane %v1287_v36, 6 }
 0x4a4   :  { %v1267_v38 = vpop.f32.mrf.mxu3 }
 0x4a5   :  { %v1293_v31 = vsel %vm972_vm3, %v1267_v38, %v1292_v37 }
 0x4a6   :  { %v1295_v41 = vadd.f32 %v1293_v31, %v1246_v40 }
 0x4a8   :  { %v1296_v44 = vmul.f32 %v1295_v41, %v2717_v5 }
 0x4aa   :  { %2229 = vtanh.f32 %v1296_v44 }
 0x4b0   :  { %v2230_v45 = vpop.eup %2229 }
 0x4b1   :  { %v1298_v46 = vmul.f32 %v2230_v45, %v2717_v5 }
 0x4b3   :  { %v1299_v47 = vadd.f32 %v1298_v46, %v2724_v39 }
 0x4b5   :  { %v1302_v23 = vrot.slane %v1299_v47, 2  ;;  %v1300_v50 = vmul.f32 %v1299_v47, %v1243_v33 }
 0x4b7   :  { %v1304_v49 = vmul.f32 %v1302_v23, %v1299_v47 }
 0x4b9   :  { %1306 = vrot.lane.b32.xlu1 %v1304_v49, %s2351_s8 }
 0x52b   :  { %v1307_v42 = vpop.permute.xlu1 %1306 }
 0x52c   :  { %v1309_v51 = vadd.f32 %v1307_v42, %v1300_v50 }
 0x52e   :  { %2231 = vtanh.f32 %v1309_v51 }
 0x534   :  { %v2232_v43 = vpop.eup %2231 }
 0x535   :  { %v1311_v53 = vmul.f32 %v2232_v43, %v1302_v23 }
 0x537   :  { %2184 = vmatmul.msk.f32.vlgmr.msra.gmra.mxu1 %vm73_vm1, %v1311_v53  ;;  %2185 = vmatmul.msk.f32.vlgmr.msra.gmra.mxu2 %vm73_vm1, %v1311_v53  ;;  %v2873_v53 = vld [vmem:[%s3108_s4 + $0x78] sm:$0xff] }
 0x538   :  { %1588 = vmatpush.msra.mxu1 %v2557_v13  ;;  %1608 = vmatpush.msra.mxu2 %v2510_v1 }
 0x53a   :  { %1589 = vmatpush.msra.mxu1 %v2570_v14  ;;  %1609 = vmatpush.msra.mxu2 %v2517_v2 }
 0x53c   :  { %1590 = vmatpush.msra.mxu1 %v2583_v16  ;;  %1610 = vmatpush.msra.mxu2 %v2523_v3 }
 0x53e   :  { %1591 = vmatpush.msra.mxu1 %v2601_v18  ;;  %1611 = vmatpush.msra.mxu2 %v2539_v10 }
 0x540   :  { %1592 = vmatpush.msra.mxu1 %v2614_v19  ;;  %1612 = vmatpush.msra.mxu2 %v2546_v11 }
 0x542   :  { %1593 = vmatpush.msra.mxu1 %v2622_v20  ;;  %1613 = vmatpush.msra.mxu2 %v2552_v12 }
 0x544   :  { %1594 = vmatpush.msra.mxu1 %v2631_v21  ;;  %1614 = vmatpush.msra.mxu2 %v2576_v15 }
 0x546   :  { %1595 = vmatpush.msra.mxu1 %v2640_v22  ;;  %1615 = vmatpush.msra.mxu2 %v2590_v17 }
 0x5b4   :  { %v1333_v56 = vpop.f32.mrf.mxu1 }
 0x5ba   :  { %v1353_v54 = vpop.f32.mrf.mxu2 }
 0x5bb   :  { %v1358_v55 = vrot.slane %v1353_v54, 6  ;;  %v2880_v54 = vld [vmem:[%s3108_s4 + $0x68] sm:$0xff] }
 0x5bd   :  { %v1359_v52 = vsel %vm972_vm3, %v1333_v56, %v1358_v55 }
 0x5be   :  { %v1361_v58 = vadd.f32 %v1359_v52, %v1312_v57  ;;  %v1510_v57 = vld [vmem:[#allocation2 + $0x1c] sm:$0xf] }
 0x5c0   :  { %v1362_v48 = vmul.f32 %v1361_v58, %v2717_v5 }
 0x5c2   :  { %2233 = vtanh.f32 %v1362_v48 }
 0x5c8   :  { %v2234_v59 = vpop.eup %2233 }
 0x5c9   :  { %v1364_v60 = vmul.f32 %v2234_v59, %v2717_v5 }
 0x5cb   :  { %v1365_v61 = vadd.f32 %v1364_v60, %v2724_v39 }
 0x5cd   :  { %v1368_v62 = vrot.slane %v1365_v61, 2  ;;  %v1366_v4 = vmul.f32 %v1365_v61, %v1309_v51 }
 0x5cf   :  { %v1370_v0 = vmul.f32 %v1368_v62, %v1365_v61 }
 0x5d1   :  { %1372 = vrot.lane.b32.xlu2 %v1370_v0, %s2351_s8 }
 0x62b   :  { %v1373_v6 = vpop.permute.xlu2 %1372 }
 0x62c   :  { %v1375_v7 = vadd.f32 %v1373_v6, %v1366_v4  ;;  %v2925_v4 = vld [vmem:[%s3108_s4 + $0x70] sm:$0xff]  ;;  %v2932_v6 = vld [vmem:[%s3108_s4 + $0x60] sm:$0xff] }
 0x62e   :  { %2235 = vtanh.f32 %v1375_v7 }
 0x634   :  { %v2236_v8 = vpop.eup %2235 }
 0x635   :  { %v1377_v9 = vmul.f32 %v2236_v8, %v1368_v62  ;;  %v2946_v8 = vld [vmem:[%s3108_s4 + $0x40] sm:$0xff] }
 0x637   :  { %2186 = vmatmul.msk.f32.vlgmr.msra.gmra.mxu3 %vm73_vm1, %v1377_v9  ;;  %2187 = vmatmul.msk.f32.vlgmr.msrb.gmra.mxu0 %vm73_vm1, %v1377_v9  ;;  %v2953_v9 = vld [vmem:[%s3108_s4 + $0x30] sm:$0xff] }
 0x638   :  { %1654 = vmatpush.msra.mxu3 %v2557_v13  ;;  %1674 = vmatpush.msrb.mxu0 %v2510_v1 }
 0x63a   :  { %1655 = vmatpush.msra.mxu3 %v2570_v14  ;;  %1675 = vmatpush.msrb.mxu0 %v2517_v2 }
 0x63c   :  { %1656 = vmatpush.msra.mxu3 %v2583_v16  ;;  %1676 = vmatpush.msrb.mxu0 %v2523_v3 }
 0x63e   :  { %1657 = vmatpush.msra.mxu3 %v2601_v18  ;;  %1677 = vmatpush.msrb.mxu0 %v2539_v10 }
 0x640   :  { %1658 = vmatpush.msra.mxu3 %v2614_v19  ;;  %1678 = vmatpush.msrb.mxu0 %v2546_v11 }
 0x642   :  { %1659 = vmatpush.msra.mxu3 %v2622_v20  ;;  %1679 = vmatpush.msrb.mxu0 %v2552_v12 }
 0x644   :  { %1660 = vmatpush.msra.mxu3 %v2631_v21  ;;  %1680 = vmatpush.msrb.mxu0 %v2576_v15 }
 0x646   :  { %1661 = vmatpush.msra.mxu3 %v2640_v22  ;;  %1681 = vmatpush.msrb.mxu0 %v2590_v17 }
 0x6b4   :  { %v1419_v24 = vpop.f32.mrf.mxu0 }
 0x6b5   :  { %v1424_v25 = vrot.slane %v1419_v24, 6  ;;  %v2960_v24 = vld [vmem:[%s3108_s4 + $0x20] sm:$0xff] }
 0x6ba   :  { %v1399_v63 = vpop.f32.mrf.mxu3 }
 0x6bb   :  { %v1425_v27 = vsel %vm972_vm3, %v1399_v63, %v1424_v25  ;;  %v2967_v25 = vld [vmem:[%s3108_s4 + $0x10] sm:$0xff]  ;;  %v2973_v63 = vld [vmem:[%s3108_s4 + $0x18] sm:$0xff] }
 0x6bc   :  { %v1427_v28 = vadd.f32 %v1425_v27, %v1378_v26  ;;  %v2979_v26 = vld [vmem:[%s3108_s4] sm:$0xff]  ;;  %v2985_v27 = vld [vmem:[%s3108_s4 + $0x8] sm:$0xff] }
 0x6be   :  { %v1428_v29 = vmul.f32 %v1427_v28, %v2717_v5 }
 0x6c0   :  { %2237 = vtanh.f32 %v1428_v29 }
 0x6c6   :  { %v2238_v30 = vpop.eup %2237 }
 0x6c7   :  { %v1430_v32 = vmul.f32 %v2238_v30, %v2717_v5 }
 0x6c9   :  { %v1431_v33 = vadd.f32 %v1430_v32, %v2724_v39  ;;  %v1576_v32 = vld [vmem:[#allocation2 + $0x20] sm:$0xf] }
 0x6cb   :  { %v1434_v34 = vrot.slane %v1431_v33, 2  ;;  %v1432_v36 = vmul.f32 %v1431_v33, %v1375_v7  ;;  %v2939_v7 = vld [vmem:[%s3108_s4 + $0x50] sm:$0xff] }
 0x6cd   :  { %v1436_v35 = vmul.f32 %v1434_v34, %v1431_v33 }
 0x6cf   :  { %1438 = vrot.lane.b32.xlu2 %v1436_v35, %s2351_s8 }
 0x729   :  { %v1439_v37 = vpop.permute.xlu2 %1438 }
 0x72a   :  { %v1441_v38 = vadd.f32 %v1439_v37, %v1432_v36 }
 0x72c   :  { %2239 = vtanh.f32 %v1441_v38 }
 0x732   :  { %v2240_v40 = vpop.eup %2239 }
 0x733   :  { %v1443_v31 = vmul.f32 %v2240_v40, %v1434_v34 }
 0x735   :  { %2188 = vmatmul.msk.f32.vlgmr.msrb.gmra.mxu1 %vm73_vm1, %v1443_v31  ;;  %2189 = vmatmul.msk.f32.vlgmr.msrb.gmra.mxu2 %vm73_vm1, %v1443_v31 }
 0x736   :  { %1720 = vmatpush.msrb.mxu1 %v2557_v13  ;;  %1740 = vmatpush.msrb.mxu2 %v2510_v1 }
 0x738   :  { %1721 = vmatpush.msrb.mxu1 %v2570_v14  ;;  %1741 = vmatpush.msrb.mxu2 %v2517_v2 }
 0x73a   :  { %1722 = vmatpush.msrb.mxu1 %v2583_v16  ;;  %1742 = vmatpush.msrb.mxu2 %v2523_v3 }
 0x73c   :  { %1723 = vmatpush.msrb.mxu1 %v2601_v18  ;;  %1743 = vmatpush.msrb.mxu2 %v2539_v10  ;;  %v1444_v10 = vld [vmem:[#allocation2 + $0x18] sm:$0xf] }
 0x73e   :  { %1724 = vmatpush.msrb.mxu1 %v2614_v19  ;;  %1744 = vmatpush.msrb.mxu2 %v2546_v11 }
 0x740   :  { %1725 = vmatpush.msrb.mxu1 %v2622_v20  ;;  %1745 = vmatpush.msrb.mxu2 %v2552_v12 }
 0x742   :  { %1726 = vmatpush.msrb.mxu1 %v2631_v21  ;;  %1746 = vmatpush.msrb.mxu2 %v2576_v15 }
 0x744   :  { %1727 = vmatpush.msrb.mxu1 %v2640_v22  ;;  %1747 = vmatpush.msrb.mxu2 %v2590_v17 }
 0x7b2   :  { %v1465_v3 = vpop.f32.mrf.mxu1 }
 0x7b8   :  { %v1485_v1 = vpop.f32.mrf.mxu2 }
 0x7b9   :  { %v1490_v2 = vrot.slane %v1485_v1, 6 }
 0x7bb   :  { %v1491_v41 = vsel %vm972_vm3, %v1465_v3, %v1490_v2 }
 0x7bc   :  { %v1493_v44 = vadd.f32 %v1491_v41, %v1444_v10 }
 0x7be   :  { %v1494_v11 = vmul.f32 %v1493_v44, %v2717_v5 }
 0x7c0   :  { %2241 = vtanh.f32 %v1494_v11 }
 0x7c6   :  { %v2242_v45 = vpop.eup %2241 }
 0x7c7   :  { %v1496_v12 = vmul.f32 %v2242_v45, %v2717_v5 }
 0x7c9   :  { %v1497_v46 = vadd.f32 %v1496_v12, %v2724_v39  ;;  %v1642_v12 = vld [vmem:[#allocation2 + $0x24] sm:$0xf] }
 0x7cb   :  { %v1500_v47 = vrot.slane %v1497_v46, 2  ;;  %v1498_v49 = vmul.f32 %v1497_v46, %v1441_v38 }
 0x7cd   :  { %v1502_v23 = vmul.f32 %v1500_v47, %v1497_v46 }
 0x7cf   :  { %1504 = vrot.lane.b32.xlu0 %v1502_v23, %s2351_s8 }
 0x841   :  { %v1505_v50 = vpop.permute.xlu0 %1504 }
 0x842   :  { %v1507_v42 = vadd.f32 %v1505_v50, %v1498_v49 }
 0x844   :  { %2243 = vtanh.f32 %v1507_v42 }
 0x84a   :  { %v2244_v51 = vpop.eup %2243 }
 0x84b   :  { %v1509_v43 = vmul.f32 %v2244_v51, %v1500_v47 }
 0x84d   :  { %2190 = vmatmul.msk.f32.vlgmr.msrb.gmra.mxu3 %vm73_vm1, %v1509_v43  ;;  %2191 = vmatmul.msk.f32.vlgmr.msra.gmra.mxu0 %vm73_vm1, %v1509_v43 }
 0x84e   :  { %1786 = vmatpush.msrb.mxu3 %v2557_v13  ;;  %1806 = vmatpush.msra.mxu0 %v2873_v53  ;;  %v2887_v13 = vld [vmem:[%s3108_s4 + $0x58] sm:$0xff] }
 0x850   :  { %1787 = vmatpush.msrb.mxu3 %v2570_v14  ;;  %1807 = vmatpush.msra.mxu0 %v2880_v54  ;;  %v2894_v14 = vld [vmem:[%s3108_s4 + $0x48] sm:$0xff] }
 0x852   :  { %1788 = vmatpush.msrb.mxu3 %v2583_v16  ;;  %1808 = vmatpush.msra.mxu0 %v2887_v13  ;;  %v2901_v16 = vld [vmem:[%s3108_s4 + $0x38] sm:$0xff] }
 0x854   :  { %1789 = vmatpush.msrb.mxu3 %v2601_v18  ;;  %1809 = vmatpush.msra.mxu0 %v2894_v14  ;;  %v2908_v18 = vld [vmem:[%s3108_s4 + $0x28] sm:$0xff] }
 0x856   :  { %1790 = vmatpush.msrb.mxu3 %v2614_v19  ;;  %1810 = vmatpush.msra.mxu0 %v2901_v16 }
 0x858   :  { %1791 = vmatpush.msrb.mxu3 %v2622_v20  ;;  %1811 = vmatpush.msra.mxu0 %v2908_v18 }
 0x85a   :  { %1792 = vmatpush.msrb.mxu3 %v2631_v21  ;;  %1812 = vmatpush.msra.mxu0 %v2576_v15 }
 0x85c   :  { %1793 = vmatpush.msrb.mxu3 %v2640_v22  ;;  %1813 = vmatpush.msra.mxu0 %v2590_v17 }
 0x8ca   :  { %v1551_v19 = vpop.f32.mrf.mxu0 }
 0x8cb   :  { %v1556_v55 = vrot.slane %v1551_v19, 6 }
 0x8d0   :  { %v1531_v56 = vpop.f32.mrf.mxu3 }
 0x8d1   :  { %v1557_v20 = vsel %vm972_vm3, %v1531_v56, %v1556_v55 }
 0x8d2   :  { %v1559_v52 = vadd.f32 %v1557_v20, %v1510_v57 }
 0x8d4   :  { %v1560_v58 = vmul.f32 %v1559_v52, %v2717_v5 }
 0x8d6   :  { %2245 = vtanh.f32 %v1560_v58 }
 0x8dc   :  { %v2246_v48 = vpop.eup %2245 }
 0x8dd   :  { %v1562_v59 = vmul.f32 %v2246_v48, %v2717_v5 }
 0x8df   :  { %v1563_v21 = vadd.f32 %v1562_v59, %v2724_v39 }
 0x8e1   :  { %v1566_v15 = vrot.slane %v1563_v21, 2  ;;  %v1564_v17 = vmul.f32 %v1563_v21, %v1507_v42 }
 0x8e3   :  { %v1568_v60 = vmul.f32 %v1566_v15, %v1563_v21 }
 0x8e5   :  { %1570 = vrot.lane.b32.xlu1 %v1568_v60, %s2351_s8 }
 0x957   :  { %v1571_v22 = vpop.permute.xlu1 %1570 }
 0x958   :  { %v1573_v61 = vadd.f32 %v1571_v22, %v1564_v17 }
 0x95a   :  { %2247 = vtanh.f32 %v1573_v61 }
 0x960   :  { %v2248_v62 = vpop.eup %2247 }
 0x961   :  { %v1575_v0 = vmul.f32 %v2248_v62, %v1566_v15 }
 0x963   :  { %2192 = vmatmul.msk.f32.vlgmr.msra.gmra.mxu1 %vm73_vm1, %v1575_v0  ;;  %2193 = vmatmul.msk.f32.vlgmr.msra.gmra.mxu2 %vm73_vm1, %v1575_v0 }
 0x964   :  { %1852 = vmatpush.msra.mxu1 %v2925_v4  ;;  %1872 = vmatpush.msra.mxu2 %v2873_v53 }
 0x966   :  { %1853 = vmatpush.msra.mxu1 %v2932_v6  ;;  %1873 = vmatpush.msra.mxu2 %v2880_v54 }
 0x968   :  { %1854 = vmatpush.msra.mxu1 %v2939_v7  ;;  %1874 = vmatpush.msra.mxu2 %v2887_v13 }
 0x96a   :  { %1855 = vmatpush.msra.mxu1 %v2946_v8  ;;  %1875 = vmatpush.msra.mxu2 %v2894_v14 }
 0x96c   :  { %1856 = vmatpush.msra.mxu1 %v2953_v9  ;;  %1876 = vmatpush.msra.mxu2 %v2901_v16 }
 0x96e   :  { %1857 = vmatpush.msra.mxu1 %v2960_v24  ;;  %1877 = vmatpush.msra.mxu2 %v2908_v18 }
 0x970   :  { %1858 = vmatpush.msra.mxu1 %v2967_v25  ;;  %1878 = vmatpush.msra.mxu2 %v2973_v63 }
 0x972   :  { %1859 = vmatpush.msra.mxu1 %v2979_v26  ;;  %1879 = vmatpush.msra.mxu2 %v2985_v27 }
 0x9e0   :  { %v1597_v30 = vpop.f32.mrf.mxu1 }
 0x9e6   :  { %v1617_v28 = vpop.f32.mrf.mxu2 }
 0x9e7   :  { %v1622_v29 = vrot.slane %v1617_v28, 6 }
 0x9e9   :  { %v1623_v33 = vsel %vm972_vm3, %v1597_v30, %v1622_v29 }
 0x9ea   :  { %v1625_v34 = vadd.f32 %v1623_v33, %v1576_v32 }
 0x9ec   :  { %v1626_v35 = vmul.f32 %v1625_v34, %v2717_v5 }
 0x9ee   :  { %2249 = vtanh.f32 %v1626_v35 }
 0x9f4   :  { %v2250_v36 = vpop.eup %2249 }
 0x9f5   :  { %v1628_v37 = vmul.f32 %v2250_v36, %v2717_v5 }
 0x9f7   :  { %v1629_v38 = vadd.f32 %v1628_v37, %v2724_v39 }
 0x9f9   :  { %v1632_v40 = vrot.slane %v1629_v38, 2  ;;  %v1630_v1 = vmul.f32 %v1629_v38, %v1573_v61 }
 0x9fb   :  { %v1634_v31 = vmul.f32 %v1632_v40, %v1629_v38  ;;  %v1840_v38 = vld [vmem:[#allocation2 + $0x30] sm:$0xf] }
 0x9fd   :  { %1636 = vrot.lane.b32.xlu2 %v1634_v31, %s2351_s8 }
 0xa57   :  { %v1637_v2 = vpop.permute.xlu2 %1636 }
 0xa58   :  { %v1639_v3 = vadd.f32 %v1637_v2, %v1630_v1 }
 0xa5a   :  { %2251 = vtanh.f32 %v1639_v3 }
 0xa60   :  { %v2252_v10 = vpop.eup %2251 }
 0xa61   :  { %v1641_v41 = vmul.f32 %v2252_v10, %v1632_v40 }
 0xa63   :  { %2194 = vmatmul.msk.f32.vlgmr.msra.gmra.mxu3 %vm73_vm1, %v1641_v41  ;;  %2195 = vmatmul.msk.f32.vlgmr.msrb.gmra.mxu0 %vm73_vm1, %v1641_v41 }
 0xa64   :  { %1918 = vmatpush.msra.mxu3 %v2925_v4  ;;  %1938 = vmatpush.msrb.mxu0 %v2873_v53 }
 0xa66   :  { %1919 = vmatpush.msra.mxu3 %v2932_v6  ;;  %1939 = vmatpush.msrb.mxu0 %v2880_v54 }
 0xa68   :  { %1920 = vmatpush.msra.mxu3 %v2939_v7  ;;  %1940 = vmatpush.msrb.mxu0 %v2887_v13 }
 0xa6a   :  { %1921 = vmatpush.msra.mxu3 %v2946_v8  ;;  %1941 = vmatpush.msrb.mxu0 %v2894_v14 }
 0xa6c   :  { %1922 = vmatpush.msra.mxu3 %v2953_v9  ;;  %1942 = vmatpush.msrb.mxu0 %v2901_v16 }
 0xa6e   :  { %1923 = vmatpush.msra.mxu3 %v2960_v24  ;;  %1943 = vmatpush.msrb.mxu0 %v2908_v18 }
 0xa70   :  { %1924 = vmatpush.msra.mxu3 %v2967_v25  ;;  %1944 = vmatpush.msrb.mxu0 %v2973_v63 }
 0xa72   :  { %1925 = vmatpush.msra.mxu3 %v2979_v26  ;;  %1945 = vmatpush.msrb.mxu0 %v2985_v27 }
 0xae0   :  { %v1683_v44 = vpop.f32.mrf.mxu0 }
 0xae1   :  { %v1688_v11 = vrot.slane %v1683_v44, 6 }
 0xae6   :  { %v1663_v45 = vpop.f32.mrf.mxu3 }
 0xae7   :  { %v1689_v46 = vsel %vm972_vm3, %v1663_v45, %v1688_v11 }
 0xae8   :  { %v1691_v47 = vadd.f32 %v1689_v46, %v1642_v12 }
 0xaea   :  { %v1692_v23 = vmul.f32 %v1691_v47, %v2717_v5 }
 0xaec   :  { %2253 = vtanh.f32 %v1692_v23 }
 0xaf2   :  { %v2254_v49 = vpop.eup %2253 }
 0xaf3   :  { %v1694_v50 = vmul.f32 %v2254_v49, %v2717_v5 }
 0xaf5   :  { %v1695_v42 = vadd.f32 %v1694_v50, %v2724_v39 }
 0xaf7   :  { %v1698_v51 = vrot.slane %v1695_v42, 2  ;;  %v1696_v19 = vmul.f32 %v1695_v42, %v1639_v3 }
 0xaf9   :  { %v1700_v43 = vmul.f32 %v1698_v51, %v1695_v42  ;;  %v1906_v42 = vld [vmem:[#allocation2 + $0x34] sm:$0xf] }
 0xafb   :  { %1702 = vrot.lane.b32.xlu0 %v1700_v43, %s2351_s8 }
 0xb6d   :  { %v1703_v55 = vpop.permute.xlu0 %1702 }
 0xb6e   :  { %v1705_v56 = vadd.f32 %v1703_v55, %v1696_v19 }
 0xb70   :  { %2255 = vtanh.f32 %v1705_v56 }
 0xb76   :  { %v2256_v57 = vpop.eup %2255 }
 0xb77   :  { %v1707_v20 = vmul.f32 %v2256_v57, %v1698_v51 }
 0xb79   :  { %2196 = vmatmul.msk.f32.vlgmr.msrb.gmra.mxu1 %vm73_vm1, %v1707_v20  ;;  %2197 = vmatmul.msk.f32.vlgmr.msrb.gmra.mxu2 %vm73_vm1, %v1707_v20 }
 0xb7a   :  { %1984 = vmatpush.msrb.mxu1 %v2925_v4  ;;  %2004 = vmatpush.msrb.mxu2 %v2873_v53 }
 0xb7c   :  { %1985 = vmatpush.msrb.mxu1 %v2932_v6  ;;  %2005 = vmatpush.msrb.mxu2 %v2880_v54 }
 0xb7e   :  { %1986 = vmatpush.msrb.mxu1 %v2939_v7  ;;  %2006 = vmatpush.msrb.mxu2 %v2887_v13  ;;  %v1774_v7 = vld [vmem:[#allocation2 + $0x2c] sm:$0xf] }
 0xb80   :  { %1987 = vmatpush.msrb.mxu1 %v2946_v8  ;;  %2007 = vmatpush.msrb.mxu2 %v2894_v14  ;;  %v1708_v14 = vld [vmem:[#allocation2 + $0x28] sm:$0xf] }
 0xb82   :  { %1988 = vmatpush.msrb.mxu1 %v2953_v9  ;;  %2008 = vmatpush.msrb.mxu2 %v2901_v16 }
 0xb84   :  { %1989 = vmatpush.msrb.mxu1 %v2960_v24  ;;  %2009 = vmatpush.msrb.mxu2 %v2908_v18 }
 0xb86   :  { %1990 = vmatpush.msrb.mxu1 %v2967_v25  ;;  %2010 = vmatpush.msrb.mxu2 %v2973_v63 }
 0xb88   :  { %1991 = vmatpush.msrb.mxu1 %v2979_v26  ;;  %2011 = vmatpush.msrb.mxu2 %v2985_v27 }
 0xbf6   :  { %v1729_v13 = vpop.f32.mrf.mxu1 }
 0xbfc   :  { %v1749_v53 = vpop.f32.mrf.mxu2 }
 0xbfd   :  { %v1754_v54 = vrot.slane %v1749_v53, 6 }
 0xbff   :  { %v1755_v52 = vsel %vm972_vm3, %v1729_v13, %v1754_v54 }
 0xc00   :  { %v1757_v58 = vadd.f32 %v1755_v52, %v1708_v14 }
 0xc02   :  { %v1758_v16 = vmul.f32 %v1757_v58, %v2717_v5 }
 0xc04   :  { %2257 = vtanh.f32 %v1758_v16  ;;  %v2048_v16 = vld [vmem:[%s3109_s5 + $0x38] sm:$0xff] }
 0xc0a   :  { %v2258_v48 = vpop.eup %2257 }
 0xc0b   :  { %v1760_v18 = vmul.f32 %v2258_v48, %v2717_v5 }
 0xc0d   :  { %v1761_v59 = vadd.f32 %v1760_v18, %v2724_v39 }
 0xc0f   :  { %v1764_v21 = vrot.slane %v1761_v59, 2  ;;  %v1762_v60 = vmul.f32 %v1761_v59, %v1705_v56 }
 0xc11   :  { %v1766_v15 = vmul.f32 %v1764_v21, %v1761_v59 }
 0xc13   :  { %1768 = vrot.lane.b32.xlu1 %v1766_v15, %s2351_s8 }
 0xc85   :  { %v1769_v17 = vpop.permute.xlu1 %1768 }
 0xc86   :  { %v1771_v22 = vadd.f32 %v1769_v17, %v1762_v60 }
 0xc88   :  { %2259 = vtanh.f32 %v1771_v22 }
 0xc8e   :  { %v2260_v61 = vpop.eup %2259 }
 0xc8f   :  { %v1773_v62 = vmul.f32 %v2260_v61, %v1764_v21  ;;  %v1972_v21 = vld [vmem:[#allocation2 + $0x38] sm:$0xf] }
 0xc91   :  { %2198 = vmatmul.msk.f32.vlgmr.msrb.gmra.mxu3 %vm73_vm1, %v1773_v62  ;;  %2199 = vmatmul.msk.f32.vlgmr.msra.gmra.mxu0 %vm73_vm1, %v1773_v62 }
 0xc92   :  { %2064 = vmatpush.msrb.mxu3 %v2048_v16 }
 0xd0e   :  { %v1815_v0 = vpop.f32.mrf.mxu0 }
 0xd0f   :  { %v1820_v4 = vrot.slane %v1815_v0, 6 }
 0xd14   :  { %v1795_v6 = vpop.f32.mrf.mxu3 }
 0xd15   :  { %v1821_v8 = vsel %vm972_vm3, %v1795_v6, %v1820_v4  ;;  %v2047_v6 = vld [vmem:[%s3109_s5 + $0x30] sm:$0xff] }
 0xd16   :  { %v1823_v9 = vadd.f32 %v1821_v8, %v1774_v7  ;;  %2065 = vmatpush.msrb.mxu3 %v2047_v6  ;;  %v2046_v7 = vld [vmem:[%s3109_s5 + $0x28] sm:$0xff]  ;;  %v2043_v8 = vld [vmem:[%s3109_s5 + $0x10] sm:$0xff] }
 0xd18   :  { %v1824_v24 = vmul.f32 %v1823_v9, %v2717_v5  ;;  %2066 = vmatpush.msrb.mxu3 %v2046_v7  ;;  %v2042_v9 = vld [vmem:[%s3109_s5 + $0x8] sm:$0xff] }
 0xd1a   :  { %2261 = vtanh.f32 %v1824_v24  ;;  %v2041_v24 = vld [vmem:[%s3109_s5] sm:$0xff] }
 0xd20   :  { %v2262_v25 = vpop.eup %2261 }
 0xd21   :  { %v1826_v63 = vmul.f32 %v2262_v25, %v2717_v5  ;;  %v2080_v25 = vld [vmem:[%s3111_s7 + $0x8] sm:$0xff] }
 0xd22   :  { %2103 = vmatpush.msra.mxu0 %v2080_v25 }
 0xd23   :  { %v1827_v26 = vadd.f32 %v1826_v63, %v2724_v39 }
 0xd25   :  { %v1830_v27 = vrot.slane %v1827_v26, 2  ;;  %v1828_v29 = vmul.f32 %v1827_v26, %v1771_v22 }
 0xd27   :  { %v1832_v28 = vmul.f32 %v1830_v27, %v1827_v26 }
 0xd29   :  { %1834 = vrot.lane.b32.xlu2 %v1832_v28, %s2351_s8 }
 0xd83   :  { %v1835_v30 = vpop.permute.xlu2 %1834 }
 0xd84   :  { %v1837_v32 = vadd.f32 %v1835_v30, %v1828_v29 }
 0xd86   :  { %2263 = vtanh.f32 %v1837_v32 }
 0xd8c   :  { %v2264_v33 = vpop.eup %2263 }
 0xd8d   :  { %v1839_v34 = vmul.f32 %v2264_v33, %v1830_v27  ;;  %v2079_v33 = vld [vmem:[%s3111_s7] sm:$0xff] }
 0xd8e   :  { %2104 = vmatpush.msra.mxu0 %v2079_v33 }
 0xd8f   :  { %2200 = vmatmul.msk.f32.vlgmr.msra.gmra.mxu1 %vm73_vm1, %v1839_v34  ;;  %2201 = vmatmul.msk.f32.vlgmr.msra.gmra.mxu2 %vm73_vm1, %v1839_v34  ;;  %v2215_v34 = vld [vmem:[%s3110_s6] ss:$0 sm:$0xff] }
 0xe0c   :  { %v1861_v37 = vpop.f32.mrf.mxu1 }
 0xe12   :  { %v1881_v35 = vpop.f32.mrf.mxu2 }
 0xe13   :  { %v1886_v36 = vrot.slane %v1881_v35, 6 }
 0xe15   :  { %v1887_v40 = vsel %vm972_vm3, %v1861_v37, %v1886_v36 }
 0xe16   :  { %v1889_v31 = vadd.f32 %v1887_v40, %v1840_v38  ;;  %v2216_v40 = vld [vmem:[#allocation3] ss:$0 sm:$0xff] }
 0xe18   :  { %v1890_v1 = vmul.f32 %v1889_v31, %v2717_v5 }
 0xe1a   :  { %2265 = vtanh.f32 %v1890_v1 }
 0xe20   :  { %v2266_v2 = vpop.eup %2265 }
 0xe21   :  { %v1892_v3 = vmul.f32 %v2266_v2, %v2717_v5 }
 0xe23   :  { %v1893_v10 = vadd.f32 %v1892_v3, %v2724_v39 }
 0xe25   :  { %v1896_v41 = vrot.slane %v1893_v10, 2  ;;  %v1894_v11 = vmul.f32 %v1893_v10, %v1837_v32 }
 0xe27   :  { %v1898_v44 = vmul.f32 %v1896_v41, %v1893_v10 }
 0xe29   :  { %1900 = vrot.lane.b32.xlu0 %v1898_v44, %s2351_s8 }
 0xe9b   :  { %v1901_v45 = vpop.permute.xlu0 %1900 }
 0xe9c   :  { %v1903_v12 = vadd.f32 %v1901_v45, %v1894_v11 }
 0xe9e   :  { %2267 = vtanh.f32 %v1903_v12 }
 0xea4   :  { %v2268_v46 = vpop.eup %2267 }
 0xea5   :  { %v1905_v47 = vmul.f32 %v2268_v46, %v1896_v41 }
 0xea7   :  { %2202 = vmatmul.msk.f32.vlgmr.msra.gmra.mxu3 %vm73_vm1, %v1905_v47  ;;  %2203 = vmatmul.msk.f32.vlgmr.msrb.gmra.mxu0 %vm73_vm1, %v1905_v47 }
 0xf24   :  { %v1947_v23 = vpop.f32.mrf.mxu0 }
 0xf25   :  { %v1952_v49 = vrot.slane %v1947_v23, 6 }
 0xf2a   :  { %v1927_v50 = vpop.f32.mrf.mxu3 }
 0xf2b   :  { %v1953_v51 = vsel %vm972_vm3, %v1927_v50, %v1952_v49 }
 0xf2c   :  { %v1955_v43 = vadd.f32 %v1953_v51, %v1906_v42 }
 0xf2e   :  { %v1956_v19 = vmul.f32 %v1955_v43, %v2717_v5 }
 0xf30   :  { %2269 = vtanh.f32 %v1956_v19 }
 0xf36   :  { %v2270_v55 = vpop.eup %2269 }
 0xf37   :  { %v1958_v56 = vmul.f32 %v2270_v55, %v2717_v5 }
 0xf39   :  { %v1959_v57 = vadd.f32 %v1958_v56, %v2724_v39 }
 0xf3b   :  { %v1962_v20 = vrot.slane %v1959_v57, 2  ;;  %v1960_v54 = vmul.f32 %v1959_v57, %v1903_v12 }
 0xf3d   :  { %v1964_v53 = vmul.f32 %v1962_v20, %v1959_v57 }
 0xf3f   :  { %1966 = vrot.lane.b32.xlu1 %v1964_v53, %s2351_s8 }
 0xfb1   :  { %v1967_v13 = vpop.permute.xlu1 %1966 }
 0xfb2   :  { %v1969_v14 = vadd.f32 %v1967_v13, %v1960_v54 }
 0xfb4   :  { %2271 = vtanh.f32 %v1969_v14 }
 0xfba   :  { %v2272_v52 = vpop.eup %2271 }
 0xfbb   :  { %v1971_v58 = vmul.f32 %v2272_v52, %v1962_v20 }
 0xfbd   :  { %2204 = vmatmul.msk.f32.vlgmr.msrb.gmra.mxu1 %vm73_vm1, %v1971_v58  ;;  %2205 = vmatmul.msk.f32.vlgmr.msrb.gmra.mxu2 %vm73_vm1, %v1971_v58 }
0x103a   :  { %v1993_v59 = vpop.f32.mrf.mxu1 }
0x1040   :  { %v2013_v48 = vpop.f32.mrf.mxu2 }
0x1041   :  { %v2018_v18 = vrot.slane %v2013_v48, 6 }
0x1043   :  { %v2019_v15 = vsel %vm972_vm3, %v1993_v59, %v2018_v18 }
0x1044   :  { %v2021_v60 = vadd.f32 %v2019_v15, %v1972_v21 }
0x1046   :  { %v2022_v17 = vmul.f32 %v2021_v60, %v2717_v5 }
0x1048   :  { %2273 = vtanh.f32 %v2022_v17 }
0x104e   :  { %v2274_v22 = vpop.eup %2273 }
0x104f   :  { %v2024_v61 = vmul.f32 %v2274_v22, %v2717_v5  ;;  %v2045_v5 = vld [vmem:[%s3109_s5 + $0x20] sm:$0xff] }
0x1050   :  { %2067 = vmatpush.msrb.mxu3 %v2045_v5 }
0x1051   :  { %v2025_v62 = vadd.f32 %v2024_v61, %v2724_v39  ;;  %v2044_v39 = vld [vmem:[%s3109_s5 + $0x18] sm:$0xff] }
0x1052   :  { %2068 = vmatpush.msrb.mxu3 %v2044_v39 }
0x1053   :  { %v2028_v0 = vrot.slane %v2025_v62, 2  ;;  %v2026_v63 = vmul.f32 %v2025_v62, %v1969_v14 }
0x1054   :  { %2069 = vmatpush.msrb.mxu3 %v2043_v8 }
0x1055   :  { %v2030_v4 = vmul.f32 %v2028_v0, %v2025_v62 }
0x1056   :  { %2070 = vmatpush.msrb.mxu3 %v2042_v9 }
0x1057   :  { %2032 = vrot.lane.b32.xlu2 %v2030_v4, %s2351_s8 }
0x1058   :  { %2071 = vmatpush.msrb.mxu3 %v2041_v24 }
0x10b1   :  { %v2033_v26 = vpop.permute.xlu2 %2032 }
0x10b2   :  { %v2035_v27 = vadd.f32 %v2033_v26, %v2026_v63 }
0x10b4   :  { %2275 = vtanh.f32 %v2035_v27 }
0x10ba   :  { %v2276_v28 = vpop.eup %2275 }
0x10bb   :  { %v2037_v29 = vmul.f32 %v2276_v28, %v2028_v0 }
0x10bd   :  { %vm2038_vm7 = vcmp.ge.f32.partialorder %v2037_v29, 0.0  ;;  %v2039_v30 = vmul.f32 0.3, %v2037_v29 }
0x10bf   :  { %v2040_v32 = vsel %vm2038_vm7, %v2037_v29, %v2039_v30 }
0x10c0   :  { %2206 = vmatmul.msk.f32.vlgmr.msrb.gmra.mxu3 %vm73_vm1, %v2040_v32 }
0x1143   :  { %v2073_v35 = vpop.f32.mrf.mxu3 }
0x1144   :  { %v2074_v36 = vadd.f32 %v2215_v34, %v2073_v35 }
0x1146   :  { %vm2076_vm8 = vcmp.ge.f32.partialorder %v2074_v36, 0.0  ;;  %v2077_v37 = vmul.f32 0.3, %v2074_v36 }
0x1148   :  { %v2078_v38 = vsel %vm2076_vm8, %v2074_v36, %v2077_v37 }
0x1149   :  { %2207 = vmatmul.msk.f32.vlgmr.msra.gmra.mxu0 %vm2085_vm9, %v2078_v38 }
0x11c6   :  { %v2106_v31 = vpop.f32.mrf.mxu0 }
0x11c7   :  { %v2107_v1 = vadd.f32 %v2216_v40, %v2106_v31 }
0x11c9   :  { %2110 = vst.msk [vmem:[%s3113_s9] sm:$0x3] %vm2109_vm10, %v2107_v1 }
0x11ca   :  { %2115 = vsyncpa [#allocation5], 1 }
0x11cb   :  { %2116 = vsyncpa [#allocation7], 1 }

</bundles_post_ra>
